<compile_context>
chip_gen: v5e
topology: v5e:2x2
jax: 0.10.0
libtpu: 0.0.40
codegen_flags: <defaults>
</compile_context>

<pallas_src>
import jax
import jax.numpy as jnp
from jax import lax
from jax.experimental import pallas as pl
from jax.experimental.pallas import tpu as pltpu


# ------------------------------ kernel bodies ------------------------------

def _gru_cell(gi, h, whh, bhn_b, C):
    """One fused GRU step (torch gate order [r, z, n]).

    gi    : (Np, 3C) f32  input-side gates, biases already folded in
    h     : (Np, C)  f32  previous hidden state (fori_loop carry)
    whh   : (C, 3C)  bf16 fused recurrent weights (hoisted load)
    bhn_b : (Np, C)  f32  recurrent bias of the n-gate (hoisted broadcast)
    """
    gh = jnp.dot(h.astype(whh.dtype), whh, preferred_element_type=jnp.float32)
    rz = jax.nn.sigmoid(gi[:, :2 * C] + gh[:, :2 * C])
    r = rz[:, :C]
    z = rz[:, C:]
    n = jnp.tanh(gi[:, 2 * C:] + r * (gh[:, 2 * C:] + bhn_b))
    return (1.0 - z) * n + z * h


def _gru_fwd_kernel(x_ref, wih_ref, bi_ref, whh_ref, bhn_ref,
                    yf_ref, h_scr, gi_scr):
    """Forward-direction GRU over one sequence block of TL timesteps."""
    Np, C = h_scr.shape
    rows = x_ref.shape[0]
    TL = rows // Np

    @pl.when(pl.program_id(0) == 0)
    def _():
        h_scr[...] = jnp.zeros_like(h_scr)

    # Input-side gate GEMM for the whole block (hoisted out of the recurrence).
    gi_scr[...] = (jnp.dot(x_ref[...], wih_ref[...],
                           preferred_element_type=jnp.float32) + bi_ref[...])

    whh = whh_ref[...]                                   # hoisted weight load
    bhn_b = jnp.broadcast_to(bhn_ref[...], (Np, C))      # hoisted broadcast

    def step(t, h):
        r0 = pl.multiple_of(t * Np, Np)
        gi = gi_scr[pl.ds(r0, Np), :]
        h_new = _gru_cell(gi, h, whh, bhn_b, C)
        yf_ref[pl.ds(r0, Np), :] = h_new
        return h_new

    h_scr[...] = lax.fori_loop(0, TL, step, h_scr[...])


def _gru_bwd_ffn_kernel(x_ref, yf_ref, wih_ref, bi_ref, whh_ref, bhn_ref,
                        ln_g_ref, ln_b_ref, w1_ref, b1_ref, w2_ref, b2_ref,
                        out_ref, h_scr, gi_scr):
    """Backward-direction GRU + direction sum + FFN for one sequence block.

    The grid walks sequence blocks in reverse order (see index_maps)."""
    Np, C = h_scr.shape
    rows = x_ref.shape[0]
    TL = rows // Np

    @pl.when(pl.program_id(0) == 0)
    def _():
        h_scr[...] = jnp.zeros_like(h_scr)

    gi_scr[...] = (jnp.dot(x_ref[...], wih_ref[...],
                           preferred_element_type=jnp.float32) + bi_ref[...])

    whh = whh_ref[...]
    bhn_b = jnp.broadcast_to(bhn_ref[...], (Np, C))

    def step(i, h):
        t = TL - 1 - i                                   # reverse within block
        r0 = pl.multiple_of(t * Np, Np)
        gi = gi_scr[pl.ds(r0, Np), :]
        h_new = _gru_cell(gi, h, whh, bhn_b, C)
        out_ref[pl.ds(r0, Np), :] = h_new                # stash backward states
        return h_new

    h_scr[...] = lax.fori_loop(0, TL, step, h_scr[...])

    # ---- direction sum + FFN, tiled per sequence block, in place on out ----
    s = yf_ref[...] + out_ref[...]                       # (rows, C) f32
    mu = jnp.mean(s, axis=-1, keepdims=True)
    var = jnp.mean((s - mu) ** 2, axis=-1, keepdims=True)
    xn = (s - mu) * lax.rsqrt(var + 1e-5)                # LayerNorm, eps = 1e-5
    xn = xn * ln_g_ref[...] + ln_b_ref[...]
    y1 = jnp.dot(xn.astype(jnp.bfloat16), w1_ref[...],
                 preferred_element_type=jnp.float32) + b1_ref[...]
    y1 = jnp.maximum(y1, 0.0)                            # ReLU
    y2 = jnp.dot(y1.astype(jnp.bfloat16), w2_ref[...],
                 preferred_element_type=jnp.float32) + b2_ref[...]
    out_ref[...] = y2


# --------------------------------- wrapper ---------------------------------

def _pick_seq_tile(L, target=128):
    t = min(L, target)
    while L % t:
        t -= 1
    return t


def gru_block_forward(x_ncl, prep, *, seq_tile=None):
    """x_ncl: (N, C, L) float32  ->  (N, C, L) float32."""
    N, C, L = x_ncl.shape
    Np = ((N + 7) // 8) * 8                  # pad batch to full sublane tiles
    TL = seq_tile if seq_tile is not None else _pick_seq_tile(L)
    assert L % TL == 0, "sequence length must be divisible by seq_tile"
    # TODO(synk): pad L to a multiple of seq_tile for lengths that don't divide.
    nblk = L // TL
    rows = TL * Np

    x = jnp.transpose(x_ncl, (2, 0, 1)).astype(jnp.float32)      # (L, N, C)
    if Np != N:
        x = jnp.pad(x, ((0, 0), (0, Np - N), (0, 0)))
    x2d = x.reshape(L * Np, C).astype(jnp.bfloat16)              # MXU operand

    cparams = pltpu.CompilerParams(
        dimension_semantics=("arbitrary",),                      # serial recurrence
        vmem_limit_bytes=32 * 1024 * 1024)                       # safe v5e..v7x

    seq_block = lambda i: (i, 0)
    rev_block = lambda i: (nblk - 1 - i, 0)
    full = lambda i: (0, 0)

    # ---- pass 1: forward direction ----
    yf = pl.pallas_call(
        _gru_fwd_kernel,
        out_shape=jax.ShapeDtypeStruct((L * Np, C), jnp.float32),
        grid_spec=pltpu.PrefetchScalarGridSpec(
            num_scalar_prefetch=0,
            grid=(nblk,),
            in_specs=[
                pl.BlockSpec((rows, C), seq_block),      # x block
                pl.BlockSpec((C, 3 * C), full),          # Wih (gates fused)
                pl.BlockSpec((1, 3 * C), full),          # folded input biases
                pl.BlockSpec((C, 3 * C), full),          # Whh (gates fused)
                pl.BlockSpec((1, C), full),              # b_hn
            ],
            out_specs=pl.BlockSpec((rows, C), seq_block),
            scratch_shapes=[pltpu.VMEM((Np, C), jnp.float32),        # h carry
                            pltpu.VMEM((rows, 3 * C), jnp.float32)]),  # gi block
        compiler_params=cparams,
    )(x2d, prep['wih_f'], prep['bi_f'], prep['whh_f'], prep['bhn_f'])

    # ---- pass 2: backward direction + direction sum + FFN ----
    out2d = pl.pallas_call(
        _gru_bwd_ffn_kernel,
        out_shape=jax.ShapeDtypeStruct((L * Np, C), jnp.float32),
        grid_spec=pltpu.PrefetchScalarGridSpec(
            num_scalar_prefetch=0,
            grid=(nblk,),
            in_specs=[
                pl.BlockSpec((rows, C), rev_block),      # x (reverse order)
                pl.BlockSpec((rows, C), rev_block),      # forward GRU states
                pl.BlockSpec((C, 3 * C), full),          # Wih_reverse
                pl.BlockSpec((1, 3 * C), full),
                pl.BlockSpec((C, 3 * C), full),          # Whh_reverse
                pl.BlockSpec((1, C), full),
                pl.BlockSpec((1, C), full),              # LN gamma
                pl.BlockSpec((1, C), full),              # LN beta
                pl.BlockSpec((C, 2 * C), full),          # W1
                pl.BlockSpec((1, 2 * C), full),          # b1
                pl.BlockSpec((2 * C, C), full),          # W2
                pl.BlockSpec((1, C), full),              # b2
            ],
            out_specs=pl.BlockSpec((rows, C), rev_block),
            scratch_shapes=[pltpu.VMEM((Np, C), jnp.float32),
                            pltpu.VMEM((rows, 3 * C), jnp.float32)]),
        compiler_params=cparams,
    )(x2d, yf, prep['wih_b'], prep['bi_b'], prep['whh_b'], prep['bhn_b'],
      prep['ln_g'], prep['ln_b'], prep['w1'], prep['b1'], prep['w2'], prep['b2'])

    out = out2d.reshape(L, Np, C)[:, :N, :]
    return jnp.transpose(out, (1, 2, 0))


# ------------------------- parameter prep (torch layout -> kernel) ----------

def make_params(key, C):
    """Parameters in torch.nn.GRU / nn.Linear layout, f32."""
    ks = jax.random.split(key, 12)
    s = 1.0 / (C ** 0.5)
    s2 = 1.0 / ((2 * C) ** 0.5)
    u = lambda k, shape, sc: jax.random.uniform(k, shape, jnp.float32, -sc, sc)
    return {
        'weight_ih_f': u(ks[0], (3 * C, C), s), 'weight_hh_f': u(ks[1], (3 * C, C), s),
        'bias_ih_f': u(ks[2], (3 * C,), s), 'bias_hh_f': u(ks[3], (3 * C,), s),
        'weight_ih_b': u(ks[4], (3 * C, C), s), 'weight_hh_b': u(ks[5], (3 * C, C), s),
        'bias_ih_b': u(ks[6], (3 * C,), s), 'bias_hh_b': u(ks[7], (3 * C,), s),
        'ln_gamma': jnp.ones((C,), jnp.float32), 'ln_beta': jnp.zeros((C,), jnp.float32),
        'w1': u(ks[8], (2 * C, C), s), 'b1': u(ks[9], (2 * C,), s),
        'w2': u(ks[10], (C, 2 * C), s2), 'b2': u(ks[11], (C,), s2),
    }


def prepare_params(p):
    """Transpose / fuse gates / fold biases / cast MXU operands to bf16."""
    C = p['weight_hh_f'].shape[1]

    def dir_params(wih, whh, bih, bhh):
        wih_cat = wih.T.astype(jnp.bfloat16)                 # (C, 3C), [r,z,n]
        whh_cat = whh.T.astype(jnp.bfloat16)                 # (C, 3C)
        bi = jnp.concatenate([bih[:2 * C] + bhh[:2 * C],     # fold b_hh for r,z
                              bih[2 * C:]]).reshape(1, 3 * C).astype(jnp.float32)
        bhn = bhh[2 * C:].reshape(1, C).astype(jnp.float32)  # b_hn stays inside r*( )
        return wih_cat, whh_cat, bi, bhn

    wih_f, whh_f, bi_f, bhn_f = dir_params(p['weight_ih_f'], p['weight_hh_f'],
                                           p['bias_ih_f'], p['bias_hh_f'])
    wih_b, whh_b, bi_b, bhn_b = dir_params(p['weight_ih_b'], p['weight_hh_b'],
                                           p['bias_ih_b'], p['bias_hh_b'])
    return {
        'wih_f': wih_f, 'whh_f': whh_f, 'bi_f': bi_f, 'bhn_f': bhn_f,
        'wih_b': wih_b, 'whh_b': whh_b, 'bi_b': bi_b, 'bhn_b': bhn_b,
        'ln_g': p['ln_gamma'].reshape(1, C), 'ln_b': p['ln_beta'].reshape(1, C),
        'w1': p['w1'].T.astype(jnp.bfloat16), 'b1': p['b1'].reshape(1, 2 * C),
        'w2': p['w2'].T.astype(jnp.bfloat16), 'b2': p['b2'].reshape(1, C),
    }


# ---------------- pure-JAX reference (same mixed-precision policy) ----------

def reference(x_ncl, prep):
    N, C, L = x_ncl.shape
    x = jnp.transpose(x_ncl, (2, 0, 1)).astype(jnp.bfloat16)     # (L, N, C)

    def run_dir(wih, bi, whh, bhn, reverse):
        gi = jnp.dot(x.reshape(L * N, C), wih,
                     preferred_element_type=jnp.float32) + bi
        gi = gi.reshape(L, N, 3 * C)

        def step(h, gi_t):
            gh = jnp.dot(h.astype(jnp.bfloat16), whh,
                         preferred_element_type=jnp.float32)
            rz = jax.nn.sigmoid(gi_t[:, :2 * C] + gh[:, :2 * C])
            r, z = rz[:, :C], rz[:, C:]
            n = jnp.tanh(gi_t[:, 2 * C:] + r * (gh[:, 2 * C:] + bhn))
            h_new = (1.0 - z) * n + z * h
            return h_new, h_new

        h0 = jnp.zeros((N, C), jnp.float32)
        _, ys = lax.scan(step, h0, gi, reverse=reverse)
        return ys                                                # (L, N, C)

    yf = run_dir(prep['wih_f'], prep['bi_f'], prep['whh_f'], prep['bhn_f'], False)
    yb = run_dir(prep['wih_b'], prep['bi_b'], prep['whh_b'], prep['bhn_b'], True)
    s = yf + yb
    mu = jnp.mean(s, axis=-1, keepdims=True)
    var = jnp.mean((s - mu) ** 2, axis=-1, keepdims=True)
    xn = (s - mu) * lax.rsqrt(var + 1e-5)
    xn = xn * prep['ln_g'] + prep['ln_b']
    y1 = jnp.dot(xn.astype(jnp.bfloat16), prep['w1'],
                 preferred_element_type=jnp.float32) + prep['b1']
    y1 = jnp.maximum(y1, 0.0)
    y2 = jnp.dot(y1.astype(jnp.bfloat16), prep['w2'],
                 preferred_element_type=jnp.float32) + prep['b2']
    return jnp.transpose(y2, (1, 2, 0))                          # (N, C, L)


# ----------------------------------- main -----------------------------------

if __name__ == "__main__":
    N, C, L = 2, 32, 16    # batch, channels (= GRU hidden size), sequence length
    key = jax.random.PRNGKey(0)
    kx, kp = jax.random.split(key)
    x = jax.random.normal(kx, (N, C, L), jnp.float32)
    prep = prepare_params(make_params(kp, C))

    fwd = jax.jit(gru_block_forward, static_argnames=("seq_tile",))
    out = jax.block_until_ready(fwd(x, prep, seq_tile=8))   # 2 sequence blocks
    assert out.shape == (N, C, L), out.shape

    ref = jax.block_until_ready(reference(x, prep))
    err = float(jnp.max(jnp.abs(out - ref)))
    assert jnp.allclose(out, ref, atol=1e-2, rtol=1e-2), err

    print("KERNEL_OK")
</pallas_src>

<mosaic_0001>
module attributes {stable_mosaic.version = 11 : i64} {
  func.func @_gru_bwd_ffn_kernel(%arg0: i32, %arg1: memref<64x32xbf16, #tpu.memory_space<vmem>>, %arg2: memref<64x32xf32, #tpu.memory_space<vmem>>, %arg3: memref<32x96xbf16, #tpu.memory_space<vmem>>, %arg4: memref<1x96xf32, #tpu.memory_space<vmem>>, %arg5: memref<32x96xbf16, #tpu.memory_space<vmem>>, %arg6: memref<1x32xf32, #tpu.memory_space<vmem>>, %arg7: memref<1x32xf32, #tpu.memory_space<vmem>>, %arg8: memref<1x32xf32, #tpu.memory_space<vmem>>, %arg9: memref<32x64xbf16, #tpu.memory_space<vmem>>, %arg10: memref<1x64xf32, #tpu.memory_space<vmem>>, %arg11: memref<64x32xbf16, #tpu.memory_space<vmem>>, %arg12: memref<1x32xf32, #tpu.memory_space<vmem>>, %arg13: memref<64x32xf32, #tpu.memory_space<vmem>>, %arg14: memref<8x32xf32, #tpu.memory_space<vmem>>, %arg15: memref<64x96xf32, #tpu.memory_space<vmem>>) attributes {dimension_semantics = [#tpu.dimension_semantics<arbitrary>], iteration_bounds = array<i64: 2>, scalar_prefetch = 0 : i64, scratch_operands = 2 : i64, tpu.core_type = #tpu.core_type<tc>, window_params = [{transform_indices = @transform_0, window_bounds = array<i64: 64, 32>}, {transform_indices = @transform_1, window_bounds = array<i64: 64, 32>}, {pipeline_mode = #tpu.pipeline_mode<synchronous>, transform_indices = @transform_2, window_bounds = array<i64: 32, 96>}, {pipeline_mode = #tpu.pipeline_mode<synchronous>, transform_indices = @transform_3, window_bounds = array<i64: 1, 96>}, {pipeline_mode = #tpu.pipeline_mode<synchronous>, transform_indices = @transform_4, window_bounds = array<i64: 32, 96>}, {pipeline_mode = #tpu.pipeline_mode<synchronous>, transform_indices = @transform_5, window_bounds = array<i64: 1, 32>}, {pipeline_mode = #tpu.pipeline_mode<synchronous>, transform_indices = @transform_6, window_bounds = array<i64: 1, 32>}, {pipeline_mode = #tpu.pipeline_mode<synchronous>, transform_indices = @transform_7, window_bounds = array<i64: 1, 32>}, {pipeline_mode = #tpu.pipeline_mode<synchronous>, transform_indices = @transform_8, window_bounds = array<i64: 32, 64>}, {pipeline_mode = #tpu.pipeline_mode<synchronous>, transform_indices = @transform_9, window_bounds = array<i64: 1, 64>}, {pipeline_mode = #tpu.pipeline_mode<synchronous>, transform_indices = @transform_10, window_bounds = array<i64: 64, 32>}, {pipeline_mode = #tpu.pipeline_mode<synchronous>, transform_indices = @transform_11, window_bounds = array<i64: 1, 32>}, {transform_indices = @transform_12, window_bounds = array<i64: 64, 32>}]} {
    %c0_i32 = arith.constant 0 : i32
    %0 = arith.cmpi eq, %arg0, %c0_i32 : i32
    %1 = arith.extui %0 : i1 to i32
    %c0_i32_0 = arith.constant 0 : i32
    %2 = arith.cmpi ne, %1, %c0_i32_0 : i32
    scf.if %2 {
      %cst_44 = arith.constant 0.000000e+00 : f32
      %60 = vector.broadcast %cst_44 : f32 to vector<8x32xf32>
      %c0_45 = arith.constant 0 : index
      %c0_46 = arith.constant 0 : index
      %61 = vector.load %arg14[%c0_45, %c0_46] : memref<8x32xf32, #tpu.memory_space<vmem>>, vector<8x32xf32>
      tpu.vector_store %arg14[%c0_45, %c0_46], %60 {strides = array<i32>} : memref<8x32xf32, #tpu.memory_space<vmem>>, vector<8x32xf32>,
    } else {
    }
    %c0 = arith.constant 0 : index
    %c0_1 = arith.constant 0 : index
    %3 = vector.load %arg1[%c0, %c0_1] : memref<64x32xbf16, #tpu.memory_space<vmem>>, vector<64x32xbf16>
    %c0_2 = arith.constant 0 : index
    %c0_3 = arith.constant 0 : index
    %4 = vector.load %arg3[%c0_2, %c0_3] : memref<32x96xbf16, #tpu.memory_space<vmem>>, vector<32x96xbf16>
    %cst = arith.constant dense<0.000000e+00> : vector<64x96xf32>
    %5 = tpu.matmul %3, %4, %cst {dimension_numbers = #tpu.dot_dimension_numbers<[1], [0], [0], [1], [0, 0, 1, 1], [], []>} : vector<64x32xbf16>, vector<32x96xbf16>, vector<64x96xf32> -> vector<64x96xf32>
    %c0_4 = arith.constant 0 : index
    %c0_5 = arith.constant 0 : index
    %6 = vector.load %arg4[%c0_4, %c0_5] : memref<1x96xf32, #tpu.memory_space<vmem>>, vector<1x96xf32>
    %7 = vector.broadcast %6 : vector<1x96xf32> to vector<64x96xf32>
    %8 = arith.addf %5, %7 : vector<64x96xf32>
    %c0_6 = arith.constant 0 : index
    %c0_7 = arith.constant 0 : index
    %9 = vector.load %arg15[%c0_6, %c0_7] : memref<64x96xf32, #tpu.memory_space<vmem>>, vector<64x96xf32>
    tpu.vector_store %arg15[%c0_6, %c0_7], %8 {strides = array<i32>} : memref<64x96xf32, #tpu.memory_space<vmem>>, vector<64x96xf32>,
    %c0_8 = arith.constant 0 : index
    %c0_9 = arith.constant 0 : index
    %10 = vector.load %arg5[%c0_8, %c0_9] : memref<32x96xbf16, #tpu.memory_space<vmem>>, vector<32x96xbf16>
    %c0_10 = arith.constant 0 : index
    %c0_11 = arith.constant 0 : index
    %11 = vector.load %arg6[%c0_10, %c0_11] : memref<1x32xf32, #tpu.memory_space<vmem>>, vector<1x32xf32>
    %12 = vector.shape_cast %11 : vector<1x32xf32> to vector<1x32xf32>
    %13 = vector.broadcast %12 : vector<1x32xf32> to vector<8x32xf32>
    %c0_12 = arith.constant 0 : index
    %c0_13 = arith.constant 0 : index
    %14 = vector.load %arg14[%c0_12, %c0_13] : memref<8x32xf32, #tpu.memory_space<vmem>>, vector<8x32xf32>
    %c0_i32_14 = arith.constant 0 : i32
    %c8_i32 = arith.constant 8 : i32
    %15 = arith.addi %c0_i32_14, %c8_i32 : i32
    %c1_i32 = arith.constant 1 : i32
    %16 = scf.for %arg16 = %c0_i32_14 to %15 step %c1_i32 iter_args(%arg17 = %14) -> (vector<8x32xf32>)  : i32 {
      %c7_i32 = arith.constant 7 : i32
      %60 = arith.subi %c7_i32, %arg16 : i32
      %c8_i32_44 = arith.constant 8 : i32
      %61 = arith.muli %60, %c8_i32_44 : i32
      %62 = tpu.assume_multiple %61, 8 : i32
      %63 = arith.index_cast %62 : i32 to index
      %c0_45 = arith.constant 0 : index
      %64 = vector.load %arg15[%63, %c0_45] : memref<64x96xf32, #tpu.memory_space<vmem>>, vector<8x96xf32>
      %65 = arith.truncf %arg17 : vector<8x32xf32> to vector<8x32xbf16>
      %cst_46 = arith.constant dense<0.000000e+00> : vector<8x96xf32>
      %66 = tpu.matmul %65, %10, %cst_46 {dimension_numbers = #tpu.dot_dimension_numbers<[1], [0], [0], [1], [0, 0, 1, 1], [], []>} : vector<8x32xbf16>, vector<32x96xbf16>, vector<8x96xf32> -> vector<8x96xf32>
      %67 = vector.extract_strided_slice %64 {offsets = [0, 0], sizes = [8, 64], strides = [1, 1]} : vector<8x96xf32> to vector<8x64xf32>
      %68 = vector.extract_strided_slice %66 {offsets = [0, 0], sizes = [8, 64], strides = [1, 1]} : vector<8x96xf32> to vector<8x64xf32>
      %69 = arith.addf %67, %68 : vector<8x64xf32>
      %70 = arith.negf %69 : vector<8x64xf32>
      %71 = math.exp %70 : vector<8x64xf32>
      %cst_47 = arith.constant 1.000000e+00 : f32
      %72 = vector.broadcast %cst_47 : f32 to vector<8x64xf32>
      %73 = arith.addf %72, %71 : vector<8x64xf32>
      %74 = arith.divf %72, %73 : vector<8x64xf32>
      %75 = vector.extract_strided_slice %74 {offsets = [0, 0], sizes = [8, 32], strides = [1, 1]} : vector<8x64xf32> to vector<8x32xf32>
      %76 = vector.extract_strided_slice %74 {offsets = [0, 32], sizes = [8, 32], strides = [1, 1]} : vector<8x64xf32> to vector<8x32xf32>
      %77 = vector.extract_strided_slice %64 {offsets = [0, 64], sizes = [8, 32], strides = [1, 1]} : vector<8x96xf32> to vector<8x32xf32>
      %78 = vector.extract_strided_slice %66 {offsets = [0, 64], sizes = [8, 32], strides = [1, 1]} : vector<8x96xf32> to vector<8x32xf32>
      %79 = arith.addf %78, %13 : vector<8x32xf32>
      %80 = arith.mulf %75, %79 : vector<8x32xf32>
      %81 = arith.addf %77, %80 : vector<8x32xf32>
      %82 = math.tanh %81 : vector<8x32xf32>
      %cst_48 = arith.constant 1.000000e+00 : f32
      %83 = vector.broadcast %cst_48 : f32 to vector<8x32xf32>
      %84 = arith.subf %83, %76 : vector<8x32xf32>
      %85 = arith.mulf %84, %82 : vector<8x32xf32>
      %86 = arith.mulf %76, %arg17 : vector<8x32xf32>
      %87 = arith.addf %85, %86 : vector<8x32xf32>
      %88 = arith.index_cast %62 : i32 to index
      %c0_49 = arith.constant 0 : index
      %89 = vector.load %arg13[%88, %c0_49] : memref<64x32xf32, #tpu.memory_space<vmem>>, vector<8x32xf32>
      tpu.vector_store %arg13[%88, %c0_49], %87 {strides = array<i32>} : memref<64x32xf32, #tpu.memory_space<vmem>>, vector<8x32xf32>,
      scf.yield %87 : vector<8x32xf32>
    }
    %c8_i32_15 = arith.constant 8 : i32
    %c0_16 = arith.constant 0 : index
    %c0_17 = arith.constant 0 : index
    %17 = vector.load %arg14[%c0_16, %c0_17] : memref<8x32xf32, #tpu.memory_space<vmem>>, vector<8x32xf32>
    tpu.vector_store %arg14[%c0_16, %c0_17], %16 {strides = array<i32>} : memref<8x32xf32, #tpu.memory_space<vmem>>, vector<8x32xf32>,
    %c0_18 = arith.constant 0 : index
    %c0_19 = arith.constant 0 : index
    %18 = vector.load %arg2[%c0_18, %c0_19] : memref<64x32xf32, #tpu.memory_space<vmem>>, vector<64x32xf32>
    %c0_20 = arith.constant 0 : index
    %c0_21 = arith.constant 0 : index
    %19 = vector.load %arg13[%c0_20, %c0_21] : memref<64x32xf32, #tpu.memory_space<vmem>>, vector<64x32xf32>
    %20 = arith.addf %18, %19 : vector<64x32xf32>
    %cst_22 = arith.constant dense<0.000000e+00> : vector<64xf32>
    %21 = vector.multi_reduction <add>, %20, %cst_22 [1] : vector<64x32xf32> to vector<64xf32>
    %22 = vector.shape_cast %21 : vector<64xf32> to vector<64x1xf32>
    %cst_23 = arith.constant 3.200000e+01 : f32
    %23 = vector.broadcast %cst_23 : f32 to vector<64x1xf32>
    %24 = arith.divf %22, %23 : vector<64x1xf32>
    %25 = vector.broadcast %24 : vector<64x1xf32> to vector<64x32xf32>
    %26 = arith.subf %20, %25 : vector<64x32xf32>
    %27 = arith.mulf %26, %26 : vector<64x32xf32>
    %cst_24 = arith.constant dense<0.000000e+00> : vector<64xf32>
    %28 = vector.multi_reduction <add>, %27, %cst_24 [1] : vector<64x32xf32> to vector<64xf32>
    %29 = vector.shape_cast %28 : vector<64xf32> to vector<64x1xf32>
    %cst_25 = arith.constant 3.200000e+01 : f32
    %30 = vector.broadcast %cst_25 : f32 to vector<64x1xf32>
    %31 = arith.divf %29, %30 : vector<64x1xf32>
    %32 = vector.broadcast %24 : vector<64x1xf32> to vector<64x32xf32>
    %33 = arith.subf %20, %32 : vector<64x32xf32>
    %cst_26 = arith.constant 9.99999974E-6 : f32
    %34 = vector.broadcast %cst_26 : f32 to vector<64x1xf32>
    %35 = arith.addf %31, %34 : vector<64x1xf32>
    %36 = math.rsqrt %35 : vector<64x1xf32>
    %37 = vector.broadcast %36 : vector<64x1xf32> to vector<64x32xf32>
    %38 = arith.mulf %33, %37 : vector<64x32xf32>
    %c0_27 = arith.constant 0 : index
    %c0_28 = arith.constant 0 : index
    %39 = vector.load %arg7[%c0_27, %c0_28] : memref<1x32xf32, #tpu.memory_space<vmem>>, vector<1x32xf32>
    %40 = vector.broadcast %39 : vector<1x32xf32> to vector<64x32xf32>
    %41 = arith.mulf %38, %40 : vector<64x32xf32>
    %c0_29 = arith.constant 0 : index
    %c0_30 = arith.constant 0 : index
    %42 = vector.load %arg8[%c0_29, %c0_30] : memref<1x32xf32, #tpu.memory_space<vmem>>, vector<1x32xf32>
    %43 = vector.broadcast %42 : vector<1x32xf32> to vector<64x32xf32>
    %44 = arith.addf %41, %43 : vector<64x32xf32>
    %45 = arith.truncf %44 : vector<64x32xf32> to vector<64x32xbf16>
    %c0_31 = arith.constant 0 : index
    %c0_32 = arith.constant 0 : index
    %46 = vector.load %arg9[%c0_31, %c0_32] : memref<32x64xbf16, #tpu.memory_space<vmem>>, vector<32x64xbf16>
    %cst_33 = arith.constant dense<0.000000e+00> : vector<64x64xf32>
    %47 = tpu.matmul %45, %46, %cst_33 {dimension_numbers = #tpu.dot_dimension_numbers<[1], [0], [0], [1], [0, 0, 1, 1], [], []>} : vector<64x32xbf16>, vector<32x64xbf16>, vector<64x64xf32> -> vector<64x64xf32>
    %c0_34 = arith.constant 0 : index
    %c0_35 = arith.constant 0 : index
    %48 = vector.load %arg10[%c0_34, %c0_35] : memref<1x64xf32, #tpu.memory_space<vmem>>, vector<1x64xf32>
    %49 = vector.broadcast %48 : vector<1x64xf32> to vector<64x64xf32>
    %50 = arith.addf %47, %49 : vector<64x64xf32>
    %cst_36 = arith.constant 0.000000e+00 : f32
    %51 = vector.broadcast %cst_36 : f32 to vector<64x64xf32>
    %52 = arith.maximumf %50, %51 : vector<64x64xf32>
    %53 = arith.truncf %52 : vector<64x64xf32> to vector<64x64xbf16>
    %c0_37 = arith.constant 0 : index
    %c0_38 = arith.constant 0 : index
    %54 = vector.load %arg11[%c0_37, %c0_38] : memref<64x32xbf16, #tpu.memory_space<vmem>>, vector<64x32xbf16>
    %cst_39 = arith.constant dense<0.000000e+00> : vector<64x32xf32>
    %55 = tpu.matmul %53, %54, %cst_39 {dimension_numbers = #tpu.dot_dimension_numbers<[1], [0], [0], [1], [0, 0, 1, 1], [], []>} : vector<64x64xbf16>, vector<64x32xbf16>, vector<64x32xf32> -> vector<64x32xf32>
    %c0_40 = arith.constant 0 : index
    %c0_41 = arith.constant 0 : index
    %56 = vector.load %arg12[%c0_40, %c0_41] : memref<1x32xf32, #tpu.memory_space<vmem>>, vector<1x32xf32>
    %57 = vector.broadcast %56 : vector<1x32xf32> to vector<64x32xf32>
    %58 = arith.addf %55, %57 : vector<64x32xf32>
    %c0_42 = arith.constant 0 : index
    %c0_43 = arith.constant 0 : index
    %59 = vector.load %arg13[%c0_42, %c0_43] : memref<64x32xf32, #tpu.memory_space<vmem>>, vector<64x32xf32>
    tpu.vector_store %arg13[%c0_42, %c0_43], %58 {strides = array<i32>} : memref<64x32xf32, #tpu.memory_space<vmem>>, vector<64x32xf32>,
    return
  }
  func.func @transform_0(%arg0: i32) -> (i32, i32) {
    %c1_i32 = arith.constant 1 : i32
    %0 = arith.subi %c1_i32, %arg0 : i32
    %c0_i32 = arith.constant 0 : i32
    %c0_i32_0 = arith.constant 0 : i32
    return %0, %c0_i32 : i32, i32
  }
  func.func @transform_1(%arg0: i32) -> (i32, i32) {
    %c1_i32 = arith.constant 1 : i32
    %0 = arith.subi %c1_i32, %arg0 : i32
    %c0_i32 = arith.constant 0 : i32
    %c0_i32_0 = arith.constant 0 : i32
    return %0, %c0_i32 : i32, i32
  }
  func.func @transform_2(%arg0: i32) -> (i32, i32) {
    %c0_i32 = arith.constant 0 : i32
    %c0_i32_0 = arith.constant 0 : i32
    %c0_i32_1 = arith.constant 0 : i32
    return %c0_i32, %c0_i32_0 : i32, i32
  }
  func.func @transform_3(%arg0: i32) -> (i32, i32) {
    %c0_i32 = arith.constant 0 : i32
    %c0_i32_0 = arith.constant 0 : i32
    %c0_i32_1 = arith.constant 0 : i32
    return %c0_i32, %c0_i32_0 : i32, i32
  }
  func.func @transform_4(%arg0: i32) -> (i32, i32) {
    %c0_i32 = arith.constant 0 : i32
    %c0_i32_0 = arith.constant 0 : i32
    %c0_i32_1 = arith.constant 0 : i32
    return %c0_i32, %c0_i32_0 : i32, i32
  }
  func.func @transform_5(%arg0: i32) -> (i32, i32) {
    %c0_i32 = arith.constant 0 : i32
    %c0_i32_0 = arith.constant 0 : i32
    %c0_i32_1 = arith.constant 0 : i32
    return %c0_i32, %c0_i32_0 : i32, i32
  }
  func.func @transform_6(%arg0: i32) -> (i32, i32) {
    %c0_i32 = arith.constant 0 : i32
    %c0_i32_0 = arith.constant 0 : i32
    %c0_i32_1 = arith.constant 0 : i32
    return %c0_i32, %c0_i32_0 : i32, i32
  }
  func.func @transform_7(%arg0: i32) -> (i32, i32) {
    %c0_i32 = arith.constant 0 : i32
    %c0_i32_0 = arith.constant 0 : i32
    %c0_i32_1 = arith.constant 0 : i32
    return %c0_i32, %c0_i32_0 : i32, i32
  }
  func.func @transform_8(%arg0: i32) -> (i32, i32) {
    %c0_i32 = arith.constant 0 : i32
    %c0_i32_0 = arith.constant 0 : i32
    %c0_i32_1 = arith.constant 0 : i32
    return %c0_i32, %c0_i32_0 : i32, i32
  }
  func.func @transform_9(%arg0: i32) -> (i32, i32) {
    %c0_i32 = arith.constant 0 : i32
    %c0_i32_0 = arith.constant 0 : i32
    %c0_i32_1 = arith.constant 0 : i32
    return %c0_i32, %c0_i32_0 : i32, i32
  }
  func.func @transform_10(%arg0: i32) -> (i32, i32) {
    %c0_i32 = arith.constant 0 : i32
    %c0_i32_0 = arith.constant 0 : i32
    %c0_i32_1 = arith.constant 0 : i32
    return %c0_i32, %c0_i32_0 : i32, i32
  }
  func.func @transform_11(%arg0: i32) -> (i32, i32) {
    %c0_i32 = arith.constant 0 : i32
    %c0_i32_0 = arith.constant 0 : i32
    %c0_i32_1 = arith.constant 0 : i32
    return %c0_i32, %c0_i32_0 : i32, i32
  }
  func.func @transform_12(%arg0: i32) -> (i32, i32) {
    %c1_i32 = arith.constant 1 : i32
    %0 = arith.subi %c1_i32, %arg0 : i32
    %c0_i32 = arith.constant 0 : i32
    %c0_i32_0 = arith.constant 0 : i32
    return %0, %c0_i32 : i32, i32
  }
}

module attributes {stable_mosaic.version = 11 : i64} {
  func.func @_gru_fwd_kernel(%arg0: i32, %arg1: memref<64x32xbf16, #tpu.memory_space<vmem>>, %arg2: memref<32x96xbf16, #tpu.memory_space<vmem>>, %arg3: memref<1x96xf32, #tpu.memory_space<vmem>>, %arg4: memref<32x96xbf16, #tpu.memory_space<vmem>>, %arg5: memref<1x32xf32, #tpu.memory_space<vmem>>, %arg6: memref<64x32xf32, #tpu.memory_space<vmem>>, %arg7: memref<8x32xf32, #tpu.memory_space<vmem>>, %arg8: memref<64x96xf32, #tpu.memory_space<vmem>>) attributes {dimension_semantics = [#tpu.dimension_semantics<arbitrary>], iteration_bounds = array<i64: 2>, scalar_prefetch = 0 : i64, scratch_operands = 2 : i64, tpu.core_type = #tpu.core_type<tc>, window_params = [{transform_indices = @transform_0, window_bounds = array<i64: 64, 32>}, {pipeline_mode = #tpu.pipeline_mode<synchronous>, transform_indices = @transform_1, window_bounds = array<i64: 32, 96>}, {pipeline_mode = #tpu.pipeline_mode<synchronous>, transform_indices = @transform_2, window_bounds = array<i64: 1, 96>}, {pipeline_mode = #tpu.pipeline_mode<synchronous>, transform_indices = @transform_3, window_bounds = array<i64: 32, 96>}, {pipeline_mode = #tpu.pipeline_mode<synchronous>, transform_indices = @transform_4, window_bounds = array<i64: 1, 32>}, {transform_indices = @transform_5, window_bounds = array<i64: 64, 32>}]} {
    %c0_i32 = arith.constant 0 : i32
    %0 = arith.cmpi eq, %arg0, %c0_i32 : i32
    %1 = arith.extui %0 : i1 to i32
    %c0_i32_0 = arith.constant 0 : i32
    %2 = arith.cmpi ne, %1, %c0_i32_0 : i32
    scf.if %2 {
      %cst_18 = arith.constant 0.000000e+00 : f32
      %18 = vector.broadcast %cst_18 : f32 to vector<8x32xf32>
      %c0_19 = arith.constant 0 : index
      %c0_20 = arith.constant 0 : index
      %19 = vector.load %arg7[%c0_19, %c0_20] : memref<8x32xf32, #tpu.memory_space<vmem>>, vector<8x32xf32>
      tpu.vector_store %arg7[%c0_19, %c0_20], %18 {strides = array<i32>} : memref<8x32xf32, #tpu.memory_space<vmem>>, vector<8x32xf32>,
    } else {
    }
    %c0 = arith.constant 0 : index
    %c0_1 = arith.constant 0 : index
    %3 = vector.load %arg1[%c0, %c0_1] : memref<64x32xbf16, #tpu.memory_space<vmem>>, vector<64x32xbf16>
    %c0_2 = arith.constant 0 : index
    %c0_3 = arith.constant 0 : index
    %4 = vector.load %arg2[%c0_2, %c0_3] : memref<32x96xbf16, #tpu.memory_space<vmem>>, vector<32x96xbf16>
    %cst = arith.constant dense<0.000000e+00> : vector<64x96xf32>
    %5 = tpu.matmul %3, %4, %cst {dimension_numbers = #tpu.dot_dimension_numbers<[1], [0], [0], [1], [0, 0, 1, 1], [], []>} : vector<64x32xbf16>, vector<32x96xbf16>, vector<64x96xf32> -> vector<64x96xf32>
    %c0_4 = arith.constant 0 : index
    %c0_5 = arith.constant 0 : index
    %6 = vector.load %arg3[%c0_4, %c0_5] : memref<1x96xf32, #tpu.memory_space<vmem>>, vector<1x96xf32>
    %7 = vector.broadcast %6 : vector<1x96xf32> to vector<64x96xf32>
    %8 = arith.addf %5, %7 : vector<64x96xf32>
    %c0_6 = arith.constant 0 : index
    %c0_7 = arith.constant 0 : index
    %9 = vector.load %arg8[%c0_6, %c0_7] : memref<64x96xf32, #tpu.memory_space<vmem>>, vector<64x96xf32>
    tpu.vector_store %arg8[%c0_6, %c0_7], %8 {strides = array<i32>} : memref<64x96xf32, #tpu.memory_space<vmem>>, vector<64x96xf32>,
    %c0_8 = arith.constant 0 : index
    %c0_9 = arith.constant 0 : index
    %10 = vector.load %arg4[%c0_8, %c0_9] : memref<32x96xbf16, #tpu.memory_space<vmem>>, vector<32x96xbf16>
    %c0_10 = arith.constant 0 : index
    %c0_11 = arith.constant 0 : index
    %11 = vector.load %arg5[%c0_10, %c0_11] : memref<1x32xf32, #tpu.memory_space<vmem>>, vector<1x32xf32>
    %12 = vector.shape_cast %11 : vector<1x32xf32> to vector<1x32xf32>
    %13 = vector.broadcast %12 : vector<1x32xf32> to vector<8x32xf32>
    %c0_12 = arith.constant 0 : index
    %c0_13 = arith.constant 0 : index
    %14 = vector.load %arg7[%c0_12, %c0_13] : memref<8x32xf32, #tpu.memory_space<vmem>>, vector<8x32xf32>
    %c0_i32_14 = arith.constant 0 : i32
    %c8_i32 = arith.constant 8 : i32
    %15 = arith.addi %c0_i32_14, %c8_i32 : i32
    %c1_i32 = arith.constant 1 : i32
    %16 = scf.for %arg9 = %c0_i32_14 to %15 step %c1_i32 iter_args(%arg10 = %14) -> (vector<8x32xf32>)  : i32 {
      %c8_i32_18 = arith.constant 8 : i32
      %18 = arith.muli %arg9, %c8_i32_18 : i32
      %19 = tpu.assume_multiple %18, 8 : i32
      %20 = arith.index_cast %19 : i32 to index
      %c0_19 = arith.constant 0 : index
      %21 = vector.load %arg8[%20, %c0_19] : memref<64x96xf32, #tpu.memory_space<vmem>>, vector<8x96xf32>
      %22 = arith.truncf %arg10 : vector<8x32xf32> to vector<8x32xbf16>
      %cst_20 = arith.constant dense<0.000000e+00> : vector<8x96xf32>
      %23 = tpu.matmul %22, %10, %cst_20 {dimension_numbers = #tpu.dot_dimension_numbers<[1], [0], [0], [1], [0, 0, 1, 1], [], []>} : vector<8x32xbf16>, vector<32x96xbf16>, vector<8x96xf32> -> vector<8x96xf32>
      %24 = vector.extract_strided_slice %21 {offsets = [0, 0], sizes = [8, 64], strides = [1, 1]} : vector<8x96xf32> to vector<8x64xf32>
      %25 = vector.extract_strided_slice %23 {offsets = [0, 0], sizes = [8, 64], strides = [1, 1]} : vector<8x96xf32> to vector<8x64xf32>
      %26 = arith.addf %24, %25 : vector<8x64xf32>
      %27 = arith.negf %26 : vector<8x64xf32>
      %28 = math.exp %27 : vector<8x64xf32>
      %cst_21 = arith.constant 1.000000e+00 : f32
      %29 = vector.broadcast %cst_21 : f32 to vector<8x64xf32>
      %30 = arith.addf %29, %28 : vector<8x64xf32>
      %31 = arith.divf %29, %30 : vector<8x64xf32>
      %32 = vector.extract_strided_slice %31 {offsets = [0, 0], sizes = [8, 32], strides = [1, 1]} : vector<8x64xf32> to vector<8x32xf32>
      %33 = vector.extract_strided_slice %31 {offsets = [0, 32], sizes = [8, 32], strides = [1, 1]} : vector<8x64xf32> to vector<8x32xf32>
      %34 = vector.extract_strided_slice %21 {offsets = [0, 64], sizes = [8, 32], strides = [1, 1]} : vector<8x96xf32> to vector<8x32xf32>
      %35 = vector.extract_strided_slice %23 {offsets = [0, 64], sizes = [8, 32], strides = [1, 1]} : vector<8x96xf32> to vector<8x32xf32>
      %36 = arith.addf %35, %13 : vector<8x32xf32>
      %37 = arith.mulf %32, %36 : vector<8x32xf32>
      %38 = arith.addf %34, %37 : vector<8x32xf32>
      %39 = math.tanh %38 : vector<8x32xf32>
      %cst_22 = arith.constant 1.000000e+00 : f32
      %40 = vector.broadcast %cst_22 : f32 to vector<8x32xf32>
      %41 = arith.subf %40, %33 : vector<8x32xf32>
      %42 = arith.mulf %41, %39 : vector<8x32xf32>
      %43 = arith.mulf %33, %arg10 : vector<8x32xf32>
      %44 = arith.addf %42, %43 : vector<8x32xf32>
      %45 = arith.index_cast %19 : i32 to index
      %c0_23 = arith.constant 0 : index
      %46 = vector.load %arg6[%45, %c0_23] : memref<64x32xf32, #tpu.memory_space<vmem>>, vector<8x32xf32>
      tpu.vector_store %arg6[%45, %c0_23], %44 {strides = array<i32>} : memref<64x32xf32, #tpu.memory_space<vmem>>, vector<8x32xf32>,
      scf.yield %44 : vector<8x32xf32>
    }
    %c8_i32_15 = arith.constant 8 : i32
    %c0_16 = arith.constant 0 : index
    %c0_17 = arith.constant 0 : index
    %17 = vector.load %arg7[%c0_16, %c0_17] : memref<8x32xf32, #tpu.memory_space<vmem>>, vector<8x32xf32>
    tpu.vector_store %arg7[%c0_16, %c0_17], %16 {strides = array<i32>} : memref<8x32xf32, #tpu.memory_space<vmem>>, vector<8x32xf32>,
    return
  }
  func.func @transform_0(%arg0: i32) -> (i32, i32) {
    %c0_i32 = arith.constant 0 : i32
    %c0_i32_0 = arith.constant 0 : i32
    return %arg0, %c0_i32 : i32, i32
  }
  func.func @transform_1(%arg0: i32) -> (i32, i32) {
    %c0_i32 = arith.constant 0 : i32
    %c0_i32_0 = arith.constant 0 : i32
    %c0_i32_1 = arith.constant 0 : i32
    return %c0_i32, %c0_i32_0 : i32, i32
  }
  func.func @transform_2(%arg0: i32) -> (i32, i32) {
    %c0_i32 = arith.constant 0 : i32
    %c0_i32_0 = arith.constant 0 : i32
    %c0_i32_1 = arith.constant 0 : i32
    return %c0_i32, %c0_i32_0 : i32, i32
  }
  func.func @transform_3(%arg0: i32) -> (i32, i32) {
    %c0_i32 = arith.constant 0 : i32
    %c0_i32_0 = arith.constant 0 : i32
    %c0_i32_1 = arith.constant 0 : i32
    return %c0_i32, %c0_i32_0 : i32, i32
  }
  func.func @transform_4(%arg0: i32) -> (i32, i32) {
    %c0_i32 = arith.constant 0 : i32
    %c0_i32_0 = arith.constant 0 : i32
    %c0_i32_1 = arith.constant 0 : i32
    return %c0_i32, %c0_i32_0 : i32, i32
  }
  func.func @transform_5(%arg0: i32) -> (i32, i32) {
    %c0_i32 = arith.constant 0 : i32
    %c0_i32_0 = arith.constant 0 : i32
    return %arg0, %c0_i32 : i32, i32
  }
}

</mosaic_0001>

<bundles_post_ra>
// kernel: gru_block_forward.2
= control target key start
LH: loop header
LB: loop body
LE: loop exit
PB: predicated region body
PF: predicated region fallthrough
CT: control target
= control target key end

     0   :  { %s662_s18 = smov 0   ;;  %s757_s0 = inlined_call_operand.vmem [shape: bf16[128,32], index: 0, kind: input, shape index: {}]   ;;  %s758_s1 = inlined_call_operand.vmem [shape: bf16[32,96], index: 1, kind: input, shape index: {}]   ;;  %s759_s2 = inlined_call_operand.vmem [shape: f32[1,96], index: 2, kind: input, shape index: {}]   ;;  %s760_s3 = inlined_call_operand.vmem [shape: bf16[32,96], index: 3, kind: input, shape index: {}]   ;;  %s761_s4 = inlined_call_operand.vmem [shape: f32[1,32], index: 4, kind: input, shape index: {}]   ;;  %s762_s5 = inlined_call_operand.vmem [shape: f32[128,32], index: 5, kind: output, shape index: {}]  }
   0x1 LB: > { %s503_s19 = sadd.s32 4294967295, %s618_s18   ;;  %p507_p0 = scmp.ge.s32.totalorder %s618_s18, 1  ;;  %s618_s18 = sphi %s662_s18, %s15_s18  }
   0x2   : > { %p188_p1 = scmp.lt.s32.totalorder %s618_s18, 3 }
   0x4   : > { %p189_p2 = pnand %p507_p0, %p188_p1 }
   0x5   : > { %s508_s20 = sshll.u32 (!%p189_p2), %s503_s19, 3  ;;  %p512_p4 = scmp.ne.s32.totalorder (!%p189_p2), %s503_s19, 0 }
   0x6   : > { %192 = sbr.rel (%p189_p2) target bundleno = 761 (0x2f9), region = 40  ;;  %p217_p3 = scmp.lt.s32.totalorder (!%p189_p2), %s508_s20, 15 }
   0xb   : > { %s765_s20 = smov (!%p217_p3, %s508_s20), 15  ;;  %232 = sbr.rel (%p512_p4) target bundleno = 18 (0x12), region = 44 }
   0xc   : > { %s509_s21 = sshll.u32 %s765_s20, 2  ;;  %s511_s22 = sshll.u32 %s765_s20, 3 }
   0xd   : > { %s220_s25 = scalar_lea.vmem %s757_s0, %s509_s21  ;;  %s676_s28 = scalar_lea.vmem %s762_s5, %s511_s22 }
  0x10   : > { %vm233_vm0 = vcmask 261120   ;;  %v628_v0 = vmov 0.0  }
  0x11   : > { %234 = vst.msk [vmem:[#allocation2] sm:$0xff] %vm233_vm0, %v628_v0 }
  0x12 PF: > { %v559_v1 = vld [vmem:[%s758_s1 + $0x8] sm:$0xff]  ;;  %v558_v2 = vld [vmem:[%s758_s1] sm:$0xff]  ;;  %vm283_vm1 = vcmask 261120   ;;  %v556_v5 = vld [vmem:[%s220_s25 + $0x10] sm:$0xff]  ;;  %vm325_vm2 = vcmask 785408   ;;  %s726_s21 = smov 0  }
  0x13   : > { %302 = vmatpush.bf16.msra.mxu0 %v559_v1  ;;  %562 = vmatpush.bf16.msra.mxu1 %v559_v1  ;;  %v554_v3 = vld [vmem:[%s220_s25] sm:$0xff]  ;;  %v555_v4 = vld [vmem:[%s220_s25 + $0x8] sm:$0xff]  ;;  %v557_v6 = vld [vmem:[%s220_s25 + $0x18] sm:$0xff] }
  0x14   : > { %563 = vmatpush.bf16.msra.mxu2 %v559_v1  ;;  %564 = vmatpush.bf16.msra.mxu3 %v559_v1  ;;  %v691_v7 = vld [vmem:[%s760_s3] sm:$0xf]  ;;  %v696_v8 = vld [vmem:[%s760_s3] sm:$0xf0]  ;;  %v701_v9 = vld [vmem:[%s760_s3 + $0x8] sm:$0xf] }
  0x15   : > { %v706_v10 = vld [vmem:[%s760_s3 + $0x8] sm:$0xf0]  ;;  %v711_v11 = vld [vmem:[%s761_s4] ss:$0 sm:$0xff] }
  0x16   : > { %v596_v13 = vld [vmem:[%s759_s2] ss:$0 sm:$0xff] }
  0x17   : > { %303 = vmatpush.bf16.msra.mxu0 %v558_v2  ;;  %565 = vmatpush.bf16.msra.mxu1 %v558_v2 }
  0x18   : > { %566 = vmatpush.bf16.msra.mxu2 %v558_v2  ;;  %567 = vmatpush.bf16.msra.mxu3 %v558_v2  ;;  %v341_v12 = vld [vmem:[#allocation2] sm:$0xff]  }
  0x1a   : > { %537 = vmatmul.msk.bf16.vlgmr.msra.gmra.mxu0 %vm283_vm1, %v554_v3  ;;  %538 = vmatmul.msk.bf16.vlgmr.msra.gmra.mxu1 %vm283_vm1, %v555_v4 }
  0x1b   : > { %539 = vmatmul.msk.bf16.vlgmr.msra.gmra.mxu2 %vm283_vm1, %v556_v5  ;;  %540 = vmatmul.msk.bf16.vlgmr.msra.gmra.mxu3 %vm283_vm1, %v557_v6 }
  0x97   : > { %v305_v14 = vpop.f32.mrf.mxu0  ;;  %v310_v15 = vpop.f32.mrf.mxu1 }
  0x98   : > { %v306_v16 = vadd.f32 %v596_v13, %v305_v14  ;;  %v311_v17 = vadd.f32 %v596_v13, %v310_v15 }
  0x9a   : > { %326 = vst.msk [vmem:[#allocation3] sm:$0xff] %vm325_vm2, %v306_v16 }
  0x9b   : > { %328 = vst.msk [vmem:[#allocation3 + $0x10] sm:$0xff] %vm325_vm2, %v311_v17 }
  0x9e   : > { %v315_v18 = vpop.f32.mrf.mxu2  ;;  %v320_v19 = vpop.f32.mrf.mxu3 }
  0x9f   : > { %v316_v20 = vadd.f32 %v596_v13, %v315_v18  ;;  %v321_v21 = vadd.f32 %v596_v13, %v320_v19  ;;  %v307_v22 = vpop.f32.mrf.mxu0  ;;  %v312_v23 = vpop.f32.mrf.mxu1 }
  0xa0   : > { %v308_v24 = vadd.f32 %v596_v13, %v307_v22  ;;  %v313_v25 = vadd.f32 %v596_v13, %v312_v23 }
  0xa1   : > { %330 = vst.msk [vmem:[#allocation3 + $0x20] sm:$0xff] %vm325_vm2, %v316_v20 }
  0xa2   : > { %332 = vst.msk [vmem:[#allocation3 + $0x30] sm:$0xff] %vm325_vm2, %v321_v21 }
  0xa3   : > { %327 = vst.msk [vmem:[#allocation3 + $0x8] sm:$0xff] %vm325_vm2, %v308_v24 }
  0xa4   : > { %329 = vst.msk [vmem:[#allocation3 + $0x18] sm:$0xff] %vm325_vm2, %v313_v25 }
  0xa6   : > { %v317_v26 = vpop.f32.mrf.mxu2  ;;  %v322_v27 = vpop.f32.mrf.mxu3 }
  0xa7   : > { %v318_v28 = vadd.f32 %v596_v13, %v317_v26  ;;  %v323_v29 = vadd.f32 %v596_v13, %v322_v27 }
  0xa9   : > { %331 = vst.msk [vmem:[#allocation3 + $0x28] sm:$0xff] %vm325_vm2, %v318_v28 }
  0xaa   : > { %333 = vst.msk [vmem:[#allocation3 + $0x38] sm:$0xff] %vm325_vm2, %v323_v29 }
  0xab LB: >> { %v549_v30 = vor.u32 %v706_v10, %v701_v9  ;;  %s629_s22 = smov 64   ;;  %v545_v31 = vor.u32 %v696_v8, %v691_v7  ;;  %s630_s23 = smov 32   ;;  %v352_v32 = vpack.c.bf16 %v622_v12, %v622_v12  ;;  %s626_s21 = sphi %s726_s21, %s347_s21   ;;  %v622_v12 = vphi %v341_v12, %v763_v12  }
  0xac   : >> { %401 = vrot.lane.b32.xlu0 %v711_v11, %s629_s22  ;;  %423 = vrot.lane.b32.xlu2 %v622_v12, %s630_s23  ;;  %s541_s24 = sshll.u32 %s626_s21, 3  ;;  %s631_s26 = smov 96  }
  0xad   : >> { %374 = vmatpush.bf16.msra.mxu0 %v549_v30  ;;  %s350_s25 = scalar_lea.vmem [#allocation3], %s541_s24  ;;  %s432_s27 = scalar_lea.vmem %s676_s28, %s541_s24 }
  0xae   : >> { %s347_s21 = sadd.s32 1, %s626_s21  }
  0xaf   : >> { %p344_p5 = scmp.ge.s32.totalorder %s347_s21, 8  }
  0xb1   : >> { %375 = vmatpush.bf16.msra.mxu0 %v545_v31  ;;  %v351_v37 = vld [vmem:[%s350_s25] sm:$0xff] }
  0xb4   : >> { %550 = vmatmul.msk.bf16.vlgmr.msra.gmra.mxu0 %vm283_vm1, %v352_v32 }
 0x106   : >> { %v424_v57 = vpop.permute.xlu2 %423 }
 0x11e   : >> { %v402_v33 = vpop.permute.xlu0 %401 }
 0x131   : >> { %v377_v34 = vpop.f32.mrf.mxu0 }
 0x132   : >> { %v404_v35 = vadd.f32 %v402_v33, %v377_v34  ;;  %v381_v38 = vadd.f32 %v377_v34, %v351_v37 }
 0x134   : >> { %406 = vrot.lane.b32.xlu0 %v404_v35, %s629_s22  ;;  %v551_v39 = vmul.f32 -1.442695, %v381_v38 }
 0x136   : >> { %598 = vpow2.f32 %v551_v39 }
 0x139   : >> { %v379_v36 = vpop.f32.mrf.mxu0 }
 0x13c   : >> { %v599_v40 = vpop.eup %598 }
 0x13d   : >> { %v385_v41 = vadd.f32 1.0, %v599_v40 }
 0x13f   : >> { %600 = vrcp.f32 %v385_v41  ;;  %v397_v47 = vand.u32 2147483648, %v385_v41  ;;  %vm391_vm4 = vweird.f32 %v385_v41  ;;  %v395_v48 = vand.u32 2147483647, %v385_v41 }
 0x141   : >> { %v398_v50 = vor.u32 1.1754944e-38, %v397_v47  ;;  %vm396_vm6 = vcmp.eq.f32.partialorder %v395_v48, 8.507059e+37 }
 0x145   : >> { %v601_v42 = vpop.eup %600 }
 0x146   : >> { %v387_v43 = vmul.f32 %v601_v42, %v385_v41  ;;  %vm392_vm3 = vweird.f32 %v601_v42 }
 0x147   : >> { %vm393_vm5 = vmor %vm391_vm4, %vm392_vm3 }
 0x148   : >> { %v388_v44 = vsub.f32 1.0, %v387_v43 }
 0x14a   : >> { %v389_v45 = vmul.f32 %v601_v42, %v388_v44 }
 0x14c   : >> { %v390_v46 = vadd.f32 %v601_v42, %v389_v45 }
 0x14e   : >> { %v394_v49 = vsel %vm393_vm5, %v601_v42, %v390_v46 }
 0x14f   : >> { %v399_v51 = vsel %vm396_vm6, %v398_v50, %v394_v49 }
 0x150   : >> { %v416_v58 = vsub.f32 1.0, %v399_v51  ;;  %v426_v60 = vmul.f32 %v424_v57, %v399_v51 }
 0x1a6   : >> { %v407_v52 = vpop.permute.xlu0 %406 }
 0x1a7   : >> { %v409_v53 = vmul.f32 %v407_v52, %v399_v51 }
 0x1a9   : >> { %411 = vrot.lane.b32.xlu1 %v409_v53, %s629_s22 }
 0x21b   : >> { %v412_v54 = vpop.permute.xlu1 %411 }
 0x21c   : >> { %v414_v55 = vadd.f32 %v412_v54, %v351_v37 }
 0x21e   : >> { %602 = vtanh.f32 %v414_v55 }
 0x224   : >> { %v603_v56 = vpop.eup %602 }
 0x225   : >> { %418 = vrot.lane.b32.xlu1 %v603_v56, %s631_s26 }
 0x297   : >> { %v419_v59 = vpop.permute.xlu1 %418 }
 0x298   : >> { %v421_v61 = vmul.f32 %v419_v59, %v416_v58 }
 0x29a   : >> { %v427_v62 = vadd.f32 %v426_v60, %v421_v61 }
 0x29c   : >> { %429 = vrot.lane.b32.xlu2 %v427_v62, %s631_s26 }
 0x2f3   : > { %346 = sbr.rel (!%p344_p5) target bundleno = 171 (0xab), region = 83 }
 0x2f6   : >> { %v430_v63 = vpop.permute.xlu2 %429  }
 0x2f7   : >> { %433 = vst.msk [vmem:[%s432_s27] sm:$0xff] %vm283_vm1, %v430_v63  ;;  %v763_v12 = vmov %v430_v63 }
 0x2f8   : > { %434 = vst.msk [vmem:[#allocation2] sm:$0xff] %vm283_vm1, %v430_v63 }
 0x2f9 PF: > { %s15_s18 = sadd.s32 1, %s618_s18  }
 0x2fa   : > { %p12_p6 = scmp.ge.s32.totalorder %s15_s18, 4  }
 0x2fc   :  { %14 = sbr.rel (!%p12_p6) target bundleno = 1 (0x1), region = 94 }

// kernel: gru_block_forward.3
= control target key start
LH: loop header
LB: loop body
LE: loop exit
PB: predicated region body
PF: predicated region fallthrough
CT: control target
= control target key end

     0   :  { %s1407_s21 = smov 0   ;;  %s1749_s0 = inlined_call_operand.vmem [shape: bf16[128,32], index: 0, kind: input, shape index: {}]   ;;  %s1750_s1 = inlined_call_operand.vmem [shape: f32[128,32], index: 1, kind: input, shape index: {}]   ;;  %s1751_s2 = inlined_call_operand.vmem [shape: bf16[32,96], index: 2, kind: input, shape index: {}]   ;;  %s1752_s3 = inlined_call_operand.vmem [shape: f32[1,96], index: 3, kind: input, shape index: {}]   ;;  %s1753_s4 = inlined_call_operand.vmem [shape: bf16[32,96], index: 4, kind: input, shape index: {}]   ;;  %s1754_s5 = inlined_call_operand.vmem [shape: f32[1,32], index: 5, kind: input, shape index: {}]   ;;  %s1755_s6 = inlined_call_operand.vmem [shape: f32[1,32], index: 6, kind: input, shape index: {}]   ;;  %s1756_s7 = inlined_call_operand.vmem [shape: f32[1,32], index: 7, kind: input, shape index: {}]   ;;  %s1757_s8 = inlined_call_operand.vmem [shape: bf16[32,64], index: 8, kind: input, shape index: {}]   ;;  %s1758_s9 = inlined_call_operand.vmem [shape: f32[1,64], index: 9, kind: input, shape index: {}]   ;;  %s1759_s10 = inlined_call_operand.vmem [shape: bf16[64,32], index: 10, kind: input, shape index: {}]   ;;  %s1760_s11 = inlined_call_operand.vmem [shape: f32[1,32], index: 11, kind: input, shape index: {}]   ;;  %s1761_s12 = inlined_call_operand.vmem [shape: f32[128,32], index: 12, kind: output, shape index: {}]  }
   0x1 LB: > { %s1143_s22 = sadd.s32 4294967295, %s1327_s21   ;;  %p1147_p0 = scmp.ge.s32.totalorder %s1327_s21, 1  ;;  %s1327_s21 = sphi %s1407_s21, %s22_s21  }
   0x2   : > { %p384_p1 = scmp.lt.s32.totalorder %s1327_s21, 3 }
   0x4   : > { %p385_p2 = pnand %p1147_p0, %p384_p1 }
   0x5   : > { %s434_s23 = ssub.s32 (!%p385_p2), 1, %s1143_s22  ;;  %p1154_p4 = scmp.ne.s32.totalorder (!%p385_p2), %s1143_s22, 0 }
   0x6   : > { %388 = sbr.rel (%p385_p2) target bundleno = 1368 (0x558), region = 68  ;;  %s1148_s24 = sshll.u32 (!%p385_p2), %s434_s23, 3 }
   0x7   : > { %p436_p3 = scmp.lt.s32.totalorder (!%p385_p2), %s1148_s24, 15 }
   0xb   : > { %s1772_s24 = smov (!%p436_p3, %s1148_s24), 15  ;;  %462 = sbr.rel (%p1154_p4) target bundleno = 18 (0x12), region = 72 }
   0xc   : > { %s1149_s25 = sshll.u32 %s1772_s24, 2  ;;  %s1151_s26 = sshll.u32 %s1772_s24, 3 }
   0xd   : > { %s439_s29 = scalar_lea.vmem %s1749_s0, %s1149_s25  ;;  %s1421_s14 = scalar_lea.vmem %s1750_s1, %s1151_s26 }
   0xe   : > { %s1426_s17 = scalar_lea.vmem %s1761_s12, %s1151_s26 }
  0x10   : > { %vm463_vm0 = vcmask 261120   ;;  %v1337_v0 = vmov 0.0  }
  0x11   : > { %464 = vst.msk [vmem:[#allocation2] sm:$0xff] %vm463_vm0, %v1337_v0 }
  0x12 PF: > { %v1233_v1 = vld [vmem:[%s1751_s2 + $0x8] sm:$0xff]  ;;  %v1232_v2 = vld [vmem:[%s1751_s2] sm:$0xff]  ;;  %vm513_vm1 = vcmask 261120   ;;  %v1230_v5 = vld [vmem:[%s439_s29 + $0x10] sm:$0xff]  ;;  %vm555_vm2 = vcmask 785408   ;;  %s1476_s19 = smov 0  }
  0x13   : > { %532 = vmatpush.bf16.msra.mxu0 %v1233_v1  ;;  %1242 = vmatpush.bf16.msra.mxu1 %v1233_v1  ;;  %v1228_v3 = vld [vmem:[%s439_s29] sm:$0xff]  ;;  %v1229_v4 = vld [vmem:[%s439_s29 + $0x8] sm:$0xff]  ;;  %v1231_v6 = vld [vmem:[%s439_s29 + $0x18] sm:$0xff] }
  0x14   : > { %1243 = vmatpush.bf16.msra.mxu2 %v1233_v1  ;;  %1244 = vmatpush.bf16.msra.mxu3 %v1233_v1  ;;  %v1441_v7 = vld [vmem:[%s1753_s4] sm:$0xf]  ;;  %v1446_v8 = vld [vmem:[%s1753_s4] sm:$0xf0]  ;;  %v1451_v9 = vld [vmem:[%s1753_s4 + $0x8] sm:$0xf] }
  0x15   : > { %v1456_v10 = vld [vmem:[%s1753_s4 + $0x8] sm:$0xf0]  ;;  %v1461_v11 = vld [vmem:[%s1754_s5] ss:$0 sm:$0xff] }
  0x16   : > { %v1283_v13 = vld [vmem:[%s1752_s3] ss:$0 sm:$0xff] }
  0x17   : > { %533 = vmatpush.bf16.msra.mxu0 %v1232_v2  ;;  %1245 = vmatpush.bf16.msra.mxu1 %v1232_v2 }
  0x18   : > { %1246 = vmatpush.bf16.msra.mxu2 %v1232_v2  ;;  %1247 = vmatpush.bf16.msra.mxu3 %v1232_v2  ;;  %v571_v12 = vld [vmem:[#allocation2] sm:$0xff]  }
  0x1a   : > { %1179 = vmatmul.msk.bf16.vlgmr.msra.gmra.mxu0 %vm513_vm1, %v1228_v3  ;;  %1180 = vmatmul.msk.bf16.vlgmr.msra.gmra.mxu1 %vm513_vm1, %v1229_v4 }
  0x1b   : > { %1181 = vmatmul.msk.bf16.vlgmr.msra.gmra.mxu2 %vm513_vm1, %v1230_v5  ;;  %1182 = vmatmul.msk.bf16.vlgmr.msra.gmra.mxu3 %vm513_vm1, %v1231_v6 }
  0x97   : > { %v535_v14 = vpop.f32.mrf.mxu0  ;;  %v540_v15 = vpop.f32.mrf.mxu1 }
  0x98   : > { %v536_v16 = vadd.f32 %v1283_v13, %v535_v14  ;;  %v541_v17 = vadd.f32 %v1283_v13, %v540_v15 }
  0x9a   : > { %556 = vst.msk [vmem:[#allocation3] sm:$0xff] %vm555_vm2, %v536_v16 }
  0x9b   : > { %558 = vst.msk [vmem:[#allocation3 + $0x10] sm:$0xff] %vm555_vm2, %v541_v17 }
  0x9e   : > { %v545_v18 = vpop.f32.mrf.mxu2  ;;  %v550_v19 = vpop.f32.mrf.mxu3 }
  0x9f   : > { %v546_v20 = vadd.f32 %v1283_v13, %v545_v18  ;;  %v551_v21 = vadd.f32 %v1283_v13, %v550_v19  ;;  %v537_v22 = vpop.f32.mrf.mxu0  ;;  %v542_v23 = vpop.f32.mrf.mxu1 }
  0xa0   : > { %v538_v24 = vadd.f32 %v1283_v13, %v537_v22  ;;  %v543_v25 = vadd.f32 %v1283_v13, %v542_v23 }
  0xa1   : > { %560 = vst.msk [vmem:[#allocation3 + $0x20] sm:$0xff] %vm555_vm2, %v546_v20 }
  0xa2   : > { %562 = vst.msk [vmem:[#allocation3 + $0x30] sm:$0xff] %vm555_vm2, %v551_v21 }
  0xa3   : > { %557 = vst.msk [vmem:[#allocation3 + $0x8] sm:$0xff] %vm555_vm2, %v538_v24 }
  0xa4   : > { %559 = vst.msk [vmem:[#allocation3 + $0x18] sm:$0xff] %vm555_vm2, %v543_v25 }
  0xa6   : > { %v547_v26 = vpop.f32.mrf.mxu2  ;;  %v552_v27 = vpop.f32.mrf.mxu3 }
  0xa7   : > { %v548_v28 = vadd.f32 %v1283_v13, %v547_v26  ;;  %v553_v29 = vadd.f32 %v1283_v13, %v552_v27 }
  0xa9   : > { %561 = vst.msk [vmem:[#allocation3 + $0x28] sm:$0xff] %vm555_vm2, %v548_v28 }
  0xaa   : > { %563 = vst.msk [vmem:[#allocation3 + $0x38] sm:$0xff] %vm555_vm2, %v553_v29 }
  0xab LB: >> { %v1191_v30 = vor.u32 %v1456_v10, %v1451_v9  ;;  %s1338_s20 = smov 64   ;;  %v1187_v31 = vor.u32 %v1446_v8, %v1441_v7  ;;  %s1339_s23 = smov 32   ;;  %v583_v32 = vpack.c.bf16 %v1331_v12, %v1331_v12  ;;  %s1335_s19 = sphi %s1476_s19, %s577_s19   ;;  %v1331_v12 = vphi %v571_v12, %v1762_v12  }
  0xac   : >> { %632 = vrot.lane.b32.xlu0 %v1461_v11, %s1338_s20  ;;  %654 = vrot.lane.b32.xlu2 %v1331_v12, %s1339_s23  ;;  %s579_s22 = ssub.s32 7, %s1335_s19  ;;  %s1340_s26 = smov 96  }
  0xad   : >> { %605 = vmatpush.bf16.msra.mxu0 %v1191_v30  ;;  %s1491_s24 = sshll.u32 %s579_s22, 3  ;;  %s577_s19 = sadd.s32 1, %s1335_s19  }
  0xae   : >> { %s581_s25 = scalar_lea.vmem [#allocation3], %s1491_s24  ;;  %s663_s27 = scalar_lea.vmem %s1426_s17, %s1491_s24 }
  0xaf   : >> { %p574_p5 = scmp.ge.s32.totalorder %s577_s19, 8  }
  0xb0   : > { %v670_v0 = vld [vmem:[%s1421_s14 + $0x20] sm:$0xff] (%p574_p5)  ;;  %v668_v2 = vld [vmem:[%s1421_s14 + $0x10] sm:$0xff] (%p574_p5)  ;;  %v671_v9 = vld [vmem:[%s1421_s14 + $0x28] sm:$0xff] (%p574_p5) }
  0xb1   : >> { %606 = vmatpush.bf16.msra.mxu0 %v1187_v31  ;;  %v582_v37 = vld [vmem:[%s581_s25] sm:$0xff]  ;;  %v669_v11 = vld [vmem:[%s1421_s14 + $0x18] sm:$0xff] (%p574_p5)  ;;  %v667_v14 = vld [vmem:[%s1421_s14 + $0x8] sm:$0xff] (%p574_p5) }
  0xb2   : > { %v666_v5 = vld [vmem:[%s1421_s14] sm:$0xff] (%p574_p5)  ;;  %v673_v24 = vld [vmem:[%s1421_s14 + $0x38] sm:$0xff] (%p574_p5)  ;;  %v672_v26 = vld [vmem:[%s1421_s14 + $0x30] sm:$0xff] (%p574_p5) }
  0xb4   : >> { %1192 = vmatmul.msk.bf16.vlgmr.msra.gmra.mxu0 %vm513_vm1, %v583_v32  ;;  %v1341_v32 = vmov (%p574_p5), 32.0  }
 0x106   : >> { %v655_v57 = vpop.permute.xlu2 %654 }
 0x11e   : >> { %v633_v33 = vpop.permute.xlu0 %632 }
 0x131   : >> { %v608_v34 = vpop.f32.mrf.mxu0 }
 0x132   : >> { %v635_v35 = vadd.f32 %v633_v33, %v608_v34  ;;  %v612_v38 = vadd.f32 %v608_v34, %v582_v37 }
 0x134   : >> { %637 = vrot.lane.b32.xlu0 %v635_v35, %s1338_s20  ;;  %v1193_v39 = vmul.f32 -1.442695, %v612_v38 }
 0x136   : >> { %1285 = vpow2.f32 %v1193_v39 }
 0x139   : >> { %v610_v36 = vpop.f32.mrf.mxu0 }
 0x13c   : >> { %v1286_v40 = vpop.eup %1285 }
 0x13d   : >> { %v616_v41 = vadd.f32 1.0, %v1286_v40 }
 0x13f   : >> { %1287 = vrcp.f32 %v616_v41  ;;  %v628_v47 = vand.u32 2147483648, %v616_v41  ;;  %vm622_vm4 = vweird.f32 %v616_v41  ;;  %v626_v48 = vand.u32 2147483647, %v616_v41 }
 0x141   : >> { %v629_v50 = vor.u32 1.1754944e-38, %v628_v47  ;;  %vm627_vm6 = vcmp.eq.f32.partialorder %v626_v48, 8.507059e+37 }
 0x145   : >> { %v1288_v42 = vpop.eup %1287 }
 0x146   : >> { %v618_v43 = vmul.f32 %v1288_v42, %v616_v41  ;;  %vm623_vm3 = vweird.f32 %v1288_v42 }
 0x147   : >> { %vm624_vm5 = vmor %vm622_vm4, %vm623_vm3 }
 0x148   : >> { %v619_v44 = vsub.f32 1.0, %v618_v43 }
 0x14a   : >> { %v620_v45 = vmul.f32 %v1288_v42, %v619_v44 }
 0x14c   : >> { %v621_v46 = vadd.f32 %v1288_v42, %v620_v45 }
 0x14e   : >> { %v625_v49 = vsel %vm624_vm5, %v1288_v42, %v621_v46 }
 0x14f   : >> { %v630_v51 = vsel %vm627_vm6, %v629_v50, %v625_v49 }
 0x150   : >> { %v647_v58 = vsub.f32 1.0, %v630_v51  ;;  %v657_v60 = vmul.f32 %v655_v57, %v630_v51 }
 0x1a6   : >> { %v638_v52 = vpop.permute.xlu0 %637 }
 0x1a7   : >> { %v640_v53 = vmul.f32 %v638_v52, %v630_v51 }
 0x1a9   : >> { %642 = vrot.lane.b32.xlu1 %v640_v53, %s1338_s20 }
 0x21b   : >> { %v643_v54 = vpop.permute.xlu1 %642 }
 0x21c   : >> { %v645_v55 = vadd.f32 %v643_v54, %v582_v37 }
 0x21e   : >> { %1289 = vtanh.f32 %v645_v55 }
 0x21f   : > { %1295 = vrcp.f32 (%p574_p5), %v1341_v32 }
 0x224   : >> { %v1290_v56 = vpop.eup %1289 }
 0x225   : >> { %649 = vrot.lane.b32.xlu1 %v1290_v56, %s1340_s26  ;;  %v1296_v33 = vpop.eup (%p574_p5), %1295 }
 0x226   : > { %v715_v34 = vmul.f32 (%p574_p5), 32.0, %v1296_v33  ;;  %vm719_vm7 = vweird.f32 (%p574_p5), %v1296_v33 }
 0x228   : > { %v716_v35 = vsub.f32 (%p574_p5), 1.0, %v715_v34 }
 0x22a   : > { %v717_v36 = vmul.f32 (%p574_p5), %v1296_v33, %v716_v35 }
 0x22c   : > { %v718_v37 = vadd.f32 (%p574_p5), %v1296_v33, %v717_v36 }
 0x22e   : > { %v1531_v38 = vsel (%p574_p5), %vm719_vm7, %v1296_v33, %v718_v37 }
 0x297   : >> { %v650_v59 = vpop.permute.xlu1 %649 }
 0x298   : >> { %v652_v61 = vmul.f32 %v650_v59, %v647_v58 }
 0x29a   : >> { %v658_v62 = vadd.f32 %v657_v60, %v652_v61 }
 0x29c   : >> { %660 = vrot.lane.b32.xlu2 %v658_v62, %s1340_s26 }
 0x2f3   : > { %576 = sbr.rel (!%p574_p5) target bundleno = 171 (0xab), region = 114 }
 0x2f6   : >> { %v661_v63 = vpop.permute.xlu2 %660  }
 0x2f7   : >> { %664 = vst.msk [vmem:[%s663_s27] sm:$0xff] %vm513_vm1, %v661_v63  ;;  %v1762_v12 = vmov %v661_v63 }
 0x2f8   : > { %665 = vst.msk [vmem:[#allocation2] sm:$0xff] %vm513_vm1, %v661_v63 }
 0x2fe   : > { %v678_v1 = vld [vmem:[%s1426_s17 + $0x20] sm:$0xff]  ;;  %v676_v4 = vld [vmem:[%s1426_s17 + $0x10] sm:$0xff]  ;;  %v679_v10 = vld [vmem:[%s1426_s17 + $0x28] sm:$0xff] }
 0x2ff   : > { %v686_v3 = vadd.f32 %v678_v1, %v670_v0  ;;  %v674_v6 = vld [vmem:[%s1426_s17] sm:$0xff]  ;;  %v684_v7 = vadd.f32 %v676_v4, %v668_v2  ;;  %v677_v13 = vld [vmem:[%s1426_s17 + $0x18] sm:$0xff]  ;;  %v675_v15 = vld [vmem:[%s1426_s17 + $0x8] sm:$0xff]  ;;  %v687_v18 = vadd.f32 %v679_v10, %v671_v9 }
 0x300   : > { %v1510_v8 = vadd.f32 %v674_v6, %v666_v5  ;;  %v685_v19 = vadd.f32 %v677_v13, %v669_v11  ;;  %v683_v20 = vadd.f32 %v675_v15, %v667_v14  ;;  %v681_v25 = vld [vmem:[%s1426_s17 + $0x38] sm:$0xff]  ;;  %v680_v27 = vld [vmem:[%s1426_s17 + $0x30] sm:$0xff] }
 0x301   : > { %v702_v12 = vsel %vm513_vm1, %v686_v3, 0.0  ;;  %v696_v16 = vsel %vm513_vm1, %v684_v7, 0.0  ;;  %v705_v21 = vsel %vm513_vm1, %v687_v18, 0.0  ;;  %v689_v28 = vadd.f32 %v681_v25, %v673_v24 }
 0x302   : > { %703 = vadd.xlane.f32.xlu1 %v702_v12  ;;  %v690_v17 = vsel %vm513_vm1, %v1510_v8, 0.0  ;;  %697 = vadd.xlane.f32.xlu0 %v696_v16  ;;  %v699_v22 = vsel %vm513_vm1, %v685_v19, 0.0  ;;  %v693_v23 = vsel %vm513_vm1, %v683_v20, 0.0  ;;  %v688_v29 = vadd.f32 %v680_v27, %v672_v26 }
 0x303   : > { %691 = vadd.xlane.f32.xlu2 %v690_v17  ;;  %v711_v30 = vsel %vm513_vm1, %v689_v28, 0.0  ;;  %v1237_v17 = vld [vmem:[%s1757_s8 + $0x8] sm:$0xff] }
 0x304   : > { %v708_v31 = vsel %vm513_vm1, %v688_v29, 0.0  ;;  %1248 = vmatpush.bf16.msra.mxu3 %v1237_v17  ;;  %939 = vmatpush.bf16.msra.mxu0 %v1237_v17  ;;  %v1293_v17 = vld [vmem:[%s1758_s9] ss:$0 sm:$0xff] }
 0x30a   : > { %706 = vadd.xlane.f32.xlu1 %v705_v21  ;;  %700 = vadd.xlane.f32.xlu0 %v699_v22  ;;  %v1236_v21 = vld [vmem:[%s1757_s8] sm:$0xff] }
 0x30b   : > { %694 = vadd.xlane.f32.xlu2 %v693_v23  ;;  %1249 = vmatpush.bf16.msra.mxu3 %v1236_v21 }
 0x30c   : > { %940 = vmatpush.bf16.msra.mxu0 %v1236_v21 }
 0x312   : > { %712 = vadd.xlane.f32.xlu1 %v711_v30  ;;  %709 = vadd.xlane.f32.xlu0 %v708_v31 }
 0x375   : > { %v704_v39 = vpop.xlane.xlu1 %703  ;;  %v698_v41 = vpop.xlane.xlu0 %697 }
 0x376   : > { %v725_v40 = vmul.f32 %v1531_v38, %v704_v39  ;;  %v692_v42 = vpop.xlane.xlu2 %691  ;;  %v723_v43 = vmul.f32 %v1531_v38, %v698_v41 }
 0x377   : > { %v721_v54 = vmul.f32 %v1531_v38, %v692_v42 }
 0x378   : > { %v1535_v44 = vsub.f32 %v686_v3, %v725_v40  ;;  %v1537_v45 = vsub.f32 %v684_v7, %v723_v43 }
 0x379   : > { %v1558_v61 = vsub.f32 %v1510_v8, %v721_v54 }
 0x37a   : > { %v741_v46 = vmul.f32 %v1535_v44, %v1535_v44  ;;  %v739_v47 = vmul.f32 %v1537_v45, %v1537_v45 }
 0x37b   : > { %v737_v7 = vmul.f32 %v1558_v61, %v1558_v61 }
 0x37c   : > { %v757_v48 = vsel %vm513_vm1, %v741_v46, 0.0  ;;  %v751_v50 = vsel %vm513_vm1, %v739_v47, 0.0 }
 0x37d   : > { %758 = vadd.xlane.f32.xlu1 %v757_v48  ;;  %v707_v49 = vpop.xlane.xlu1 %706  ;;  %v701_v52 = vpop.xlane.xlu0 %700  ;;  %752 = vadd.xlane.f32.xlu2 %v751_v50  ;;  %v745_v11 = vsel %vm513_vm1, %v737_v7, 0.0 }
 0x37e   : > { %v726_v51 = vmul.f32 %v1531_v38, %v707_v49  ;;  %v695_v53 = vpop.xlane.xlu2 %694  ;;  %v724_v55 = vmul.f32 %v1531_v38, %v701_v52 }
 0x37f   : > { %v722_v56 = vmul.f32 %v1531_v38, %v695_v53 }
 0x380   : > { %v1549_v57 = vsub.f32 %v687_v18, %v726_v51  ;;  %v1551_v58 = vsub.f32 %v685_v19, %v724_v55 }
 0x381   : > { %v1553_v59 = vsub.f32 %v683_v20, %v722_v56 }
 0x382   : > { %v742_v60 = vmul.f32 %v1549_v57, %v1549_v57  ;;  %v740_v62 = vmul.f32 %v1551_v58, %v1551_v58 }
 0x383   : > { %v738_v63 = vmul.f32 %v1553_v59, %v1553_v59 }
 0x384   : > { %v760_v0 = vsel %vm513_vm1, %v742_v60, 0.0  ;;  %v754_v1 = vsel %vm513_vm1, %v740_v62, 0.0 }
 0x385   : > { %v748_v2 = vsel %vm513_vm1, %v738_v63, 0.0  ;;  %v713_v3 = vpop.xlane.xlu1 %712  ;;  %755 = vadd.xlane.f32.xlu0 %v754_v1  ;;  %v710_v4 = vpop.xlane.xlu0 %709  ;;  %761 = vadd.xlane.f32.xlu2 %v760_v0 }
 0x386   : > { %v727_v5 = vmul.f32 %v1531_v38, %v710_v4  ;;  %749 = vadd.xlane.f32.xlu1 %v748_v2  ;;  %v728_v6 = vmul.f32 %v1531_v38, %v713_v3 }
 0x388   : > { %v1571_v8 = vsub.f32 %v688_v29, %v727_v5  ;;  %v1573_v9 = vsub.f32 %v689_v28, %v728_v6 }
 0x38a   : > { %v743_v10 = vmul.f32 %v1571_v8, %v1571_v8  ;;  %v744_v13 = vmul.f32 %v1573_v9, %v1573_v9 }
 0x38c   : > { %v763_v12 = vsel %vm513_vm1, %v743_v10, 0.0  ;;  %v766_v14 = vsel %vm513_vm1, %v744_v13, 0.0  ;;  %v1635_v13 = vld [vmem:[%s1755_s6] ss:$0 sm:$0xff] }
 0x38d   : > { %764 = vadd.xlane.f32.xlu2 %v763_v12  ;;  %746 = vadd.xlane.f32.xlu0 %v745_v11 }
 0x395   : > { %767 = vadd.xlane.f32.xlu0 %v766_v14 }
 0x3f0   : > { %v759_v15 = vpop.xlane.xlu1 %758  ;;  %v753_v16 = vpop.xlane.xlu2 %752 }
 0x3f1   : > { %v771_v18 = vmul.f32 %v753_v16, %v1531_v38  ;;  %v773_v19 = vmul.f32 %v759_v15, %v1531_v38 }
 0x3f3   : > { %v779_v20 = vadd.f32 1e-05, %v771_v18  ;;  %v1590_v22 = vadd.f32 1e-05, %v773_v19 }
 0x3f5   : > { %1297 = vrsqrt.f32 %v779_v20  ;;  %vm811_vm9 = vweird.f32 %v779_v20  ;;  %vm831_vm4 = vweird.f32 %v1590_v22 }
 0x3f6   : > { %1299 = vrsqrt.f32 %v1590_v22 }
 0x3f8   : > { %v756_v23 = vpop.xlane.xlu0 %755  ;;  %v762_v24 = vpop.xlane.xlu2 %761 }
 0x3f9   : > { %v772_v25 = vmul.f32 %v756_v23, %v1531_v38  ;;  %v750_v26 = vpop.xlane.xlu1 %749  ;;  %v774_v27 = vmul.f32 %v762_v24, %v1531_v38  ;;  %v1652_v23 = vld [vmem:[%s1756_s7] ss:$0 sm:$0xff] }
 0x3fa   : > { %v770_v28 = vmul.f32 %v750_v26, %v1531_v38 }
 0x3fb   : > { %v1298_v29 = vpop.eup %1297  ;;  %v780_v30 = vadd.f32 1e-05, %v772_v25  ;;  %v1596_v31 = vadd.f32 1e-05, %v774_v27 }
 0x3fc   : > { %v806_v32 = vmul.f32 %v1298_v29, %v779_v20  ;;  %v778_v33 = vadd.f32 1e-05, %v770_v28  ;;  %v1599_v39 = vpop.eup %1299  ;;  %vm812_vm8 = vweird.f32 %v1298_v29 }
 0x3fd   : > { %1301 = vrsqrt.f32 %v780_v30  ;;  %v826_v48 = vmul.f32 %v1599_v39, %v1590_v22  ;;  %vm1615_vm10 = vmor %vm811_vm9, %vm812_vm8  ;;  %vm821_vm11 = vweird.f32 %v780_v30  ;;  %vm841_vm2 = vweird.f32 %v1596_v31 }
 0x3fe   : > { %v807_v34 = vmul.f32 %v1298_v29, %v806_v32  ;;  %1303 = vrsqrt.f32 %v778_v33  ;;  %vm801_vm13 = vweird.f32 %v778_v33  ;;  %vm832_vm5 = vweird.f32 %v1599_v39 }
 0x3ff   : > { %1305 = vrsqrt.f32 %v1596_v31  ;;  %v827_v62 = vmul.f32 %v1599_v39, %v826_v48  ;;  %vm1673_vm9 = vmor %vm831_vm4, %vm832_vm5 }
 0x400   : > { %v808_v35 = vmul.f32 0.5, %v807_v34  ;;  %v747_v36 = vpop.xlane.xlu0 %746  ;;  %v765_v37 = vpop.xlane.xlu2 %764 }
 0x401   : > { %v769_v40 = vmul.f32 %v747_v36, %v1531_v38  ;;  %v775_v46 = vmul.f32 %v765_v37, %v1531_v38  ;;  %v828_v14 = vmul.f32 0.5, %v827_v62 }
 0x402   : > { %v809_v41 = vsub.f32 1.5, %v808_v35 }
 0x403   : > { %v1302_v42 = vpop.eup %1301  ;;  %v1602_v43 = vadd.f32 1e-05, %v769_v40  ;;  %v1620_v60 = vadd.f32 1e-05, %v775_v46  ;;  %v829_v24 = vsub.f32 1.5, %v828_v14 }
 0x404   : > { %v1605_v47 = vpop.eup %1303  ;;  %v810_v49 = vmul.f32 %v1298_v29, %v809_v41  ;;  %v816_v50 = vmul.f32 %v1302_v42, %v780_v30  ;;  %vm822_vm12 = vweird.f32 %v1302_v42 }
 0x405   : > { %v1609_v51 = vpop.eup %1305  ;;  %v796_v52 = vmul.f32 %v1605_v47, %v778_v33  ;;  %1307 = vrsqrt.f32 %v1602_v43  ;;  %vm802_vm14 = vweird.f32 %v1605_v47  ;;  %vm823_vm15 = vmor %vm821_vm11, %vm822_vm12  ;;  %vm791_vm6 = vweird.f32 %v1602_v43 }
 0x406   : > { %v817_v53 = vmul.f32 %v1302_v42, %v816_v50  ;;  %v836_v54 = vmul.f32 %v1609_v51, %v1596_v31  ;;  %v814_v2 = vsel %vm1615_vm10, %v1298_v29, %v810_v49  ;;  %1309 = vrsqrt.f32 %v1620_v60  ;;  %vm1641_vm0 = vmor %vm801_vm13, %vm802_vm14 }
 0x407   : > { %v797_v56 = vmul.f32 %v1605_v47, %v796_v52  ;;  %v867_v12 = vmul.f32 %v814_v2, %v1537_v45  ;;  %vm842_vm3 = vweird.f32 %v1609_v51  ;;  %v830_v35 = vmul.f32 %v1599_v39, %v829_v24 }
 0x408   : > { %v818_v63 = vmul.f32 0.5, %v817_v53  ;;  %v837_v0 = vmul.f32 %v1609_v51, %v836_v54  ;;  %v768_v1 = vpop.xlane.xlu0 %767  ;;  %vm1665_vm8 = vmor %vm841_vm2, %vm842_vm3  ;;  %vm851_vm13 = vweird.f32 %v1620_v60  ;;  %vm1010_vm2 = vcmask 523264  }
 0x409   : > { %v798_v3 = vmul.f32 0.5, %v797_v56  ;;  %v776_v4 = vmul.f32 %v768_v1, %v1531_v38  ;;  %v879_v21 = vmul.f32 %v1635_v13, %v867_v12  ;;  %v834_v49 = vsel %vm1673_vm9, %v1599_v39, %v830_v35 }
 0x40a   : > { %v819_v5 = vsub.f32 1.5, %v818_v63  ;;  %v838_v6 = vmul.f32 0.5, %v837_v0  ;;  %v869_v55 = vmul.f32 %v834_v49, %v1535_v44 }
 0x40b   : > { %v1308_v7 = vpop.eup %1307  ;;  %v799_v10 = vsub.f32 1.5, %v798_v3  ;;  %v1629_v11 = vadd.f32 1e-05, %v776_v4  ;;  %v891_v33 = vadd.f32 %v1652_v23, %v879_v21 }
 0x40c   : > { %v820_v38 = vmul.f32 %v1302_v42, %v819_v5  ;;  %v786_v15 = vmul.f32 %v1308_v7, %v1602_v43  ;;  %v839_v45 = vsub.f32 1.5, %v838_v6  ;;  %v1310_v27 = vpop.eup %1309  ;;  %vm792_vm7 = vweird.f32 %v1308_v7 }
 0x40d   : > { %v800_v16 = vmul.f32 %v1605_v47, %v799_v10  ;;  %1311 = vrsqrt.f32 %v1629_v11  ;;  %v846_v40 = vmul.f32 %v1310_v27, %v1620_v60  ;;  %vm793_vm10 = vmor %vm791_vm6, %vm792_vm7  ;;  %v881_v39 = vmul.f32 %v1635_v13, %v869_v55 }
 0x40e   : > { %v787_v18 = vmul.f32 %v1308_v7, %v786_v15  ;;  %v824_v19 = vsel %vm823_vm15, %v1302_v42, %v820_v38  ;;  %v840_v28 = vmul.f32 %v1609_v51, %v839_v45  ;;  %vm861_vm11 = vweird.f32 %v1629_v11  ;;  %v1241_v38 = vld [vmem:[%s1759_s10 + $0x18] sm:$0xff] }
 0x40f   : > { %v868_v20 = vmul.f32 %v824_v19, %v1551_v58  ;;  %v804_v26 = vsel %vm1641_vm0, %v1605_v47, %v800_v16  ;;  %v847_v48 = vmul.f32 %v1310_v27, %v846_v40  ;;  %vm852_vm14 = vweird.f32 %v1310_v27  ;;  %1027 = vmatpush.bf16.msra.mxu1 %v1241_v38  ;;  %1250 = vmatpush.bf16.msra.mxu2 %v1241_v38 }
 0x410   : > { %v788_v25 = vmul.f32 0.5, %v787_v18  ;;  %v866_v34 = vmul.f32 %v804_v26, %v1553_v59  ;;  %v844_v46 = vsel %vm1665_vm8, %v1609_v51, %v840_v28  ;;  %v893_v44 = vadd.f32 %v1652_v23, %v881_v39  ;;  %vm853_vm0 = vmor %vm851_vm13, %vm852_vm14 }
 0x411   : > { %v880_v58 = vmul.f32 %v1635_v13, %v868_v20  ;;  %v870_v52 = vmul.f32 %v844_v46, %v1549_v57  ;;  %v848_v56 = vmul.f32 0.5, %v847_v48  ;;  %v1294_v46 = vld [vmem:[%s1760_s11] ss:$0 sm:$0xff] }
 0x412   : > { %v789_v29 = vsub.f32 1.5, %v788_v25  ;;  %v878_v47 = vmul.f32 %v1635_v13, %v866_v34 }
 0x413   : > { %v1312_v30 = vpop.eup %1311  ;;  %v892_v22 = vadd.f32 %v1652_v23, %v880_v58  ;;  %v882_v62 = vmul.f32 %v1635_v13, %v870_v52  ;;  %v849_v0 = vsub.f32 1.5, %v848_v56 }
 0x414   : > { %v790_v37 = vmul.f32 %v1308_v7, %v789_v29  ;;  %v856_v31 = vmul.f32 %v1312_v30, %v1629_v11  ;;  %v890_v51 = vadd.f32 %v1652_v23, %v878_v47  ;;  %vm862_vm12 = vweird.f32 %v1312_v30 }
 0x415   : > { %v898_v41 = vpack.c.bf16 %v892_v22, %v891_v33  ;;  %v894_v57 = vadd.f32 %v1652_v23, %v882_v62  ;;  %vm863_vm15 = vmor %vm861_vm11, %vm862_vm12  ;;  %v850_v2 = vmul.f32 %v1310_v27, %v849_v0 }
 0x416   : > { %v857_v42 = vmul.f32 %v1312_v30, %v856_v31  ;;  %v794_v43 = vsel %vm793_vm10, %v1308_v7, %v790_v37 }
 0x417   : > { %1203 = vmatmul.msk.bf16.vlgmr.msra.gmra.mxu3 %vm513_vm1, %v898_v41  ;;  %v865_v59 = vmul.f32 %v794_v43, %v1558_v61  ;;  %v899_v3 = vpack.c.bf16 %v894_v57, %v893_v44  ;;  %v854_v5 = vsel %vm853_vm0, %v1310_v27, %v850_v2 }
 0x418   : > { %v858_v53 = vmul.f32 0.5, %v857_v42  ;;  %v871_v7 = vmul.f32 %v854_v5, %v1571_v8  ;;  %v1240_v8 = vld [vmem:[%s1759_s10 + $0x10] sm:$0xff] }
 0x419   : > { %v877_v50 = vmul.f32 %v1635_v13, %v865_v59  ;;  %1028 = vmatpush.bf16.msra.mxu1 %v1240_v8  ;;  %1251 = vmatpush.bf16.msra.mxu2 %v1240_v8 }
 0x41a   : > { %v859_v63 = vsub.f32 1.5, %v858_v53  ;;  %v883_v60 = vmul.f32 %v1635_v13, %v871_v7 }
 0x41b   : > { %v889_v54 = vadd.f32 %v1652_v23, %v877_v50 }
 0x41c   : > { %v860_v1 = vmul.f32 %v1312_v30, %v859_v63  ;;  %v895_v12 = vadd.f32 %v1652_v23, %v883_v60 }
 0x41d   : > { %v897_v61 = vpack.c.bf16 %v890_v51, %v889_v54 }
 0x41e   : > { %v864_v4 = vsel %vm863_vm15, %v1312_v30, %v860_v1 }
 0x41f   : > { %1202 = vmatmul.msk.bf16.vlgmr.msra.gmra.mxu0 %vm513_vm1, %v897_v61  ;;  %v872_v6 = vmul.f32 %v864_v4, %v1573_v9  ;;  %v1239_v9 = vld [vmem:[%s1759_s10 + $0x8] sm:$0xff] }
 0x420   : > { %1029 = vmatpush.bf16.msra.mxu1 %v1239_v9  ;;  %1252 = vmatpush.bf16.msra.mxu2 %v1239_v9 }
 0x421   : > { %v884_v10 = vmul.f32 %v1635_v13, %v872_v6  ;;  %v1238_v13 = vld [vmem:[%s1759_s10] sm:$0xff] }
 0x423   : > { %v896_v11 = vadd.f32 %v1652_v23, %v884_v10 }
 0x424   : > { %1030 = vmatpush.bf16.msra.mxu1 %v1238_v13  ;;  %1253 = vmatpush.bf16.msra.mxu2 %v1238_v13 }
 0x425   : > { %v900_v14 = vpack.c.bf16 %v896_v11, %v895_v12 }
 0x427   : > { %1204 = vmatmul.msk.bf16.gmra.mxu3 %vm513_vm1, %v899_v3 }
 0x437   : > { %1205 = vmatmul.msk.bf16.gmra.mxu3 %vm513_vm1, %v900_v14 }
 0x49a   : > { %v947_v15 = vpop.f32.mrf.mxu3 }
 0x49b   : > { %v948_v28 = vadd.f32 %v1293_v17, %v947_v15 }
 0x49c   : > { %v942_v16 = vpop.f32.mrf.mxu0 }
 0x49d   : > { %v943_v18 = vadd.f32 %v1293_v17, %v942_v16  ;;  %v964_v22 = vmax.f32 %v948_v28, 0.0 }
 0x49f   : > { %v962_v21 = vmax.f32 %v943_v18, 0.0 }
 0x4a2   : > { %v949_v45 = vpop.f32.mrf.mxu3 }
 0x4a3   : > { %v950_v26 = vadd.f32 %v1293_v17, %v949_v45 }
 0x4a4   : > { %v944_v19 = vpop.f32.mrf.mxu0 }
 0x4a5   : > { %v945_v20 = vadd.f32 %v1293_v17, %v944_v19  ;;  %v965_v30 = vmax.f32 %v950_v26, 0.0 }
 0x4a7   : > { %v963_v23 = vmax.f32 %v945_v20, 0.0  ;;  %v971_v35 = vpack.c.bf16 %v965_v30, %v964_v22 }
 0x4a9   : > { %v970_v24 = vpack.c.bf16 %v963_v23, %v962_v21 }
 0x4aa   : > { %v952_v25 = vpop.f32.mrf.mxu3 }
 0x4ab   : > { %1222 = vmatmul.msk.bf16.vlgmr.msra.gmra.mxu1 %vm1010_vm2, %v970_v24  ;;  %v953_v27 = vadd.f32 %v1293_v17, %v952_v25 }
 0x4ad   : > { %v966_v32 = vmax.f32 %v953_v27, 0.0 }
 0x4b2   : > { %v954_v58 = vpop.f32.mrf.mxu3 }
 0x4b3   : > { %v955_v29 = vadd.f32 %v1293_v17, %v954_v58 }
 0x4b5   : > { %v967_v33 = vmax.f32 %v955_v29, 0.0 }
 0x4b7   : > { %v972_v34 = vpack.c.bf16 %v967_v33, %v966_v32 }
 0x4b9   : > { %1224 = vmatmul.msk.bf16.vlgmr.msra.gmra.mxu2 %vm1010_vm2, %v972_v34 }
 0x4ba   : > { %v957_v36 = vpop.f32.mrf.mxu3 }
 0x4bb   : > { %1223 = vmatmul.msk.bf16.gmra.mxu1 %vm1010_vm2, %v971_v35  ;;  %v958_v37 = vadd.f32 %v1293_v17, %v957_v36 }
 0x4bd   : > { %v968_v41 = vmax.f32 %v958_v37, 0.0 }
 0x4c2   : > { %v959_v40 = vpop.f32.mrf.mxu3 }
 0x4c3   : > { %v960_v31 = vadd.f32 %v1293_v17, %v959_v40 }
 0x4c5   : > { %v969_v42 = vmax.f32 %v960_v31, 0.0 }
 0x4c7   : > { %v973_v43 = vpack.c.bf16 %v969_v42, %v968_v41 }
 0x4c9   : > { %1225 = vmatmul.msk.bf16.gmra.mxu2 %vm1010_vm2, %v973_v43 }
 0x528   : > { %v1032_v59 = vpop.f32.mrf.mxu1 }
 0x529   : > { %v1033_v47 = vadd.f32 %v1294_v46, %v1032_v59 }
 0x52b   : > { %1052 = vst.msk [vmem:[%s1426_s17] sm:$0xff] %vm513_vm1, %v1033_v47 }
 0x530   : > { %v1034_v48 = vpop.f32.mrf.mxu1 }
 0x531   : > { %v1035_v49 = vadd.f32 %v1294_v46, %v1034_v48 }
 0x533   : > { %1053 = vst.msk [vmem:[%s1426_s17 + $0x8] sm:$0xff] %vm513_vm1, %v1035_v49 }
 0x538   : > { %v1037_v50 = vpop.f32.mrf.mxu1 }
 0x539   : > { %v1038_v52 = vadd.f32 %v1294_v46, %v1037_v50 }
 0x53b   : > { %1054 = vst.msk [vmem:[%s1426_s17 + $0x10] sm:$0xff] %vm513_vm1, %v1038_v52 }
 0x53c   : > { %v1042_v53 = vpop.f32.mrf.mxu2 }
 0x53d   : > { %v1043_v54 = vadd.f32 %v1294_v46, %v1042_v53 }
 0x53f   : > { %1056 = vst.msk [vmem:[%s1426_s17 + $0x20] sm:$0xff] %vm513_vm1, %v1043_v54 }
 0x540   : > { %v1039_v51 = vpop.f32.mrf.mxu1 }
 0x541   : > { %v1040_v55 = vadd.f32 %v1294_v46, %v1039_v51 }
 0x543   : > { %1055 = vst.msk [vmem:[%s1426_s17 + $0x18] sm:$0xff] %vm513_vm1, %v1040_v55 }
 0x544   : > { %v1044_v56 = vpop.f32.mrf.mxu2 }
 0x545   : > { %v1045_v61 = vadd.f32 %v1294_v46, %v1044_v56 }
 0x547   : > { %1057 = vst.msk [vmem:[%s1426_s17 + $0x28] sm:$0xff] %vm513_vm1, %v1045_v61 }
 0x54c   : > { %v1047_v62 = vpop.f32.mrf.mxu2 }
 0x54d   : > { %v1048_v63 = vadd.f32 %v1294_v46, %v1047_v62 }
 0x54f   : > { %1058 = vst.msk [vmem:[%s1426_s17 + $0x30] sm:$0xff] %vm513_vm1, %v1048_v63 }
 0x554   : > { %v1049_v39 = vpop.f32.mrf.mxu2 }
 0x555   : > { %v1050_v0 = vadd.f32 %v1294_v46, %v1049_v39 }
 0x557   : > { %1059 = vst.msk [vmem:[%s1426_s17 + $0x38] sm:$0xff] %vm513_vm1, %v1050_v0 }
 0x558 PF: > { %s22_s21 = sadd.s32 1, %s1327_s21  }
 0x559   : > { %p19_p6 = scmp.ge.s32.totalorder %s22_s21, 4  }
 0x55b   :  { %21 = sbr.rel (!%p19_p6) target bundleno = 1 (0x1), region = 125 }

</bundles_post_ra>
